<compile_context>
chip_gen: v7x
topology: tpu7x:2x2x1
jax: 0.10.0
libtpu: 0.0.40
codegen_flags: <defaults>
</compile_context>

<pallas_src>
import math

import numpy as np
import jax
import jax.numpy as jnp
from jax.experimental import pallas as pl
from jax.experimental.pallas import tpu as pltpu


# ---------------------------------------------------------------------------
# Fused kernel: conv1x1 (low-res) -> nearest-2x upsample (MXU) -> bias -> concat
# ---------------------------------------------------------------------------
def _upsampling_kernel(x_ref, w_ref, b_ref, d_ref, r_ref, o_ref):
    """One (batch, spatial-tile) step.

    x_ref: (C,  Thw)    f32   low-res NCHW rows of x
    w_ref: (Ch, C)      bf16  1x1 conv weight
    b_ref: (Ch, 1)      f32   bias
    d_ref: (Thw, 4*Thw) f32   0/1 nearest-2x duplication matrix
    r_ref: (Ch, 4*Thw)  f32   skip tensor tile (already high-res NCHW rows)
    o_ref: (2*Ch, 4*Thw) f32  output tile (high-res NCHW rows)
    """
    ch = w_ref.shape[0]

    # 1x1 conv at LOW resolution (exactly equal to conv-after-nearest-2x).
    x = x_ref[...].astype(jnp.bfloat16)                     # cast in-kernel (VPU)
    y = jnp.dot(w_ref[...], x,
                preferred_element_type=jnp.float32)         # (Ch, Thw) f32

    # Nearest-2x upsample as an MXU matmul with a 0/1 duplication matrix.
    # Every column of D holds exactly one 1 -> exact f32 column gather, no
    # lane-interleave / tiny-lane reshapes on the VPU/XLU.
    up = jnp.dot(y, d_ref[...],
                 preferred_element_type=jnp.float32)        # (Ch, 4*Thw) f32

    o_ref[:ch, :] = up + b_ref[...]                         # fused bias epilogue
    o_ref[ch:, :] = r_ref[...]                              # fused channel concat


# ---------------------------------------------------------------------------
# Helpers
# ---------------------------------------------------------------------------
def _nearest2x_dup_matrix(t_hw, w):
    """(t_hw, 4*t_hw) 0/1 matrix so that  y_flat @ D  == nearest-2x upsample.

    `t_hw` must be a multiple of `w` (whole input rows per tile); the block is
    then identical for every spatial tile, so one copy is shared by the grid.
    """
    assert t_hw % w == 0
    q = np.arange(4 * t_hw)
    h2, w2 = q // (2 * w), q % (2 * w)
    src = (h2 // 2) * w + (w2 // 2)          # low-res flat index feeding column q
    d = np.zeros((t_hw, 4 * t_hw), np.float32)
    d[src, q] = 1.0
    return jnp.asarray(d)                    # baked compile-time constant


def _pick_spatial_tile(hw, w, cap=512):
    """Largest multiple of lcm(w, 128) <= cap dividing hw; else the full plane."""
    if hw <= cap:
        return hw
    step = w * 128 // math.gcd(w, 128)
    t = (cap // step) * step
    while t >= step:
        if hw % t == 0:
            return t
        t -= step
    return hw   # TODO(synk): single-block fallback for awkward large planes


# ---------------------------------------------------------------------------
# UpSampling.forward
# ---------------------------------------------------------------------------
def upsampling_forward(x_nchw, r_nchw, w_oi, bias):
    """cat([Conv2d(C, C//2, 1)(nearest2x(x)), r], dim=1), all in one Pallas pass.

    x_nchw: (B, C, H, W)      r_nchw: (B, C//2, 2H, 2W)
    w_oi:   (C//2, C)         bias: (C//2,)
    returns (B, C, 2H, 2W) float32 (NCHW)
    """
    B, C, H, W = x_nchw.shape
    Ch = w_oi.shape[0]
    Cout = 2 * Ch
    assert w_oi.shape == (Ch, C) and bias.shape == (Ch,)
    assert r_nchw.shape == (B, Ch, 2 * H, 2 * W)

    HW = H * W
    t_hw = _pick_spatial_tile(HW, W)
    n_sp = HW // t_hw

    # NCHW consumed / produced directly: x[b] is already the (C, H*W) RHS of the
    # matmul and the result is already high-res NCHW rows -> no transposes.
    x3 = x_nchw.reshape(B, C, HW)                       # free (contiguous) reshape
    r3 = r_nchw.reshape(B, Ch, 4 * HW)                  # free reshape
    w_bf = w_oi.astype(jnp.bfloat16)                    # one-time cast of reused weight
    b2 = bias.astype(jnp.float32).reshape(Ch, 1)
    dmat = _nearest2x_dup_matrix(t_hw, W)               # (t_hw, 4*t_hw) f32

    # VMEM footprint (double-buffered); only raise the limit when actually needed,
    # capped by the chip's physical VMEM (64 MiB on v7x, 128 MiB on v5e/v6e).
    itemsize = jnp.dtype(x3.dtype).itemsize
    vmem_need = 2 * (C * t_hw * itemsize + Ch * C * 2 + Ch * 4
                     + t_hw * 4 * t_hw * 4 + Ch * 4 * t_hw * 4
                     + Cout * 4 * t_hw * 4)
    vmem_limit = None
    if vmem_need > (12 << 20):
        try:
            cap_bytes = pltpu.get_tpu_info().vmem_capacity_bytes
        except Exception:
            cap_bytes = 64 << 20
        vmem_limit = min(vmem_need + (4 << 20), int(cap_bytes * 0.5))

    cost = pl.CostEstimate(
        flops=2 * B * Ch * C * HW + 2 * B * Ch * HW * 4 * t_hw,
        transcendentals=0,
        bytes_accessed=(B * C * HW * itemsize + Ch * C * 2 + Ch * 4
                        + t_hw * 4 * t_hw * 4
                        + B * Ch * 4 * HW * 4 + B * Cout * 4 * HW * 4))

    out3 = pl.pallas_call(
        _upsampling_kernel,
        out_shape=jax.ShapeDtypeStruct((B, Cout, 4 * HW), jnp.float32),
        grid_spec=pltpu.PrefetchScalarGridSpec(
            num_scalar_prefetch=0,
            grid=(B, n_sp),
            in_specs=[
                pl.BlockSpec((None, C, t_hw), lambda b, j: (b, 0, j)),       # x
                pl.BlockSpec((Ch, C), lambda b, j: (0, 0)),                  # weight
                pl.BlockSpec((Ch, 1), lambda b, j: (0, 0)),                  # bias
                pl.BlockSpec((t_hw, 4 * t_hw), lambda b, j: (0, 0)),         # dup matrix
                pl.BlockSpec((None, Ch, 4 * t_hw), lambda b, j: (b, 0, j)),  # r
            ],
            out_specs=pl.BlockSpec((None, Cout, 4 * t_hw), lambda b, j: (b, 0, j)),
        ),
        compiler_params=pltpu.CompilerParams(
            dimension_semantics=("parallel", "parallel"),
            vmem_limit_bytes=vmem_limit,
        ),
        cost_estimate=cost,
    )(x3, w_bf, b2, dmat, r3)

    return out3.reshape(B, Cout, 2 * H, 2 * W)           # free reshape back to NCHW


# ---------------------------------------------------------------------------
# Demo / self-check
# ---------------------------------------------------------------------------
if __name__ == "__main__":
    key = jax.random.PRNGKey(0)
    kx, kr, kw, kb = jax.random.split(key, 4)

    B, C, H, W = 2, 256, 16, 16                      # small UNet decoder stage
    x = jax.random.normal(kx, (B, C, H, W), jnp.float32)
    r = jax.random.normal(kr, (B, C // 2, 2 * H, 2 * W), jnp.float32)
    w = 0.05 * jax.random.normal(kw, (C // 2, C), jnp.float32)   # Conv2d (O, I) weight
    b = 0.05 * jax.random.normal(kb, (C // 2,), jnp.float32)

    fwd = jax.jit(upsampling_forward)
    out = fwd(x, r, w, b)
    jax.block_until_ready(out)

    # Pure-JAX f32 reference in the exact PyTorch order: upsample -> conv -> concat.
    ref_up = jnp.repeat(jnp.repeat(x, 2, axis=2), 2, axis=3)
    ref_conv = jnp.einsum('bchw,oc->bohw', ref_up, w) + b[None, :, None, None]
    ref = jnp.concatenate([ref_conv, r], axis=1)

    assert out.shape == (B, C, 2 * H, 2 * W), out.shape
    assert bool(jnp.all(jnp.isfinite(out)))
    err = float(jnp.max(jnp.abs(out - ref)))
    assert err < 5e-2, f"max abs err vs f32 reference: {err}"   # bf16-operand tolerance
    print("KERNEL_OK")
</pallas_src>

<mosaic_0001>
module attributes {stable_mosaic.version = 11 : i64} {
  func.func @_upsampling_kernel(%arg0: i32, %arg1: i32, %arg2: memref<1x256x256xf32, #tpu.memory_space<vmem>>, %arg3: memref<128x256xbf16, #tpu.memory_space<vmem>>, %arg4: memref<128x1xf32, #tpu.memory_space<vmem>>, %arg5: memref<256x1024xf32, #tpu.memory_space<vmem>>, %arg6: memref<1x128x1024xf32, #tpu.memory_space<vmem>>, %arg7: memref<1x256x1024xf32, #tpu.memory_space<vmem>>) attributes {dimension_semantics = [#tpu.dimension_semantics<parallel>, #tpu.dimension_semantics<parallel>], iteration_bounds = array<i64: 2, 1>, scalar_prefetch = 0 : i64, scratch_operands = 0 : i64, tpu.core_type = #tpu.core_type<tc>, window_params = [{transform_indices = @transform_0, window_bounds = array<i64: 1, 256, 256>}, {pipeline_mode = #tpu.pipeline_mode<synchronous>, transform_indices = @transform_1, window_bounds = array<i64: 128, 256>}, {pipeline_mode = #tpu.pipeline_mode<synchronous>, transform_indices = @transform_2, window_bounds = array<i64: 128, 1>}, {pipeline_mode = #tpu.pipeline_mode<synchronous>, transform_indices = @transform_3, window_bounds = array<i64: 256, 1024>}, {transform_indices = @transform_4, window_bounds = array<i64: 1, 128, 1024>}, {transform_indices = @transform_5, window_bounds = array<i64: 1, 256, 1024>}]} {
    %c0 = arith.constant 0 : index
    %c0_0 = arith.constant 0 : index
    %c0_1 = arith.constant 0 : index
    %0 = vector.load %arg2[%c0, %c0_0, %c0_1] : memref<1x256x256xf32, #tpu.memory_space<vmem>>, vector<1x256x256xf32>
    %1 = vector.shape_cast %0 : vector<1x256x256xf32> to vector<256x256xf32>
    %2 = arith.truncf %1 : vector<256x256xf32> to vector<256x256xbf16>
    %c0_2 = arith.constant 0 : index
    %c0_3 = arith.constant 0 : index
    %3 = vector.load %arg3[%c0_2, %c0_3] : memref<128x256xbf16, #tpu.memory_space<vmem>>, vector<128x256xbf16>
    %cst = arith.constant dense<0.000000e+00> : vector<128x256xf32>
    %4 = tpu.matmul %3, %2, %cst {dimension_numbers = #tpu.dot_dimension_numbers<[1], [0], [0], [1], [0, 0, 1, 1], [], []>} : vector<128x256xbf16>, vector<256x256xbf16>, vector<128x256xf32> -> vector<128x256xf32>
    %c0_4 = arith.constant 0 : index
    %c0_5 = arith.constant 0 : index
    %5 = vector.load %arg5[%c0_4, %c0_5] : memref<256x1024xf32, #tpu.memory_space<vmem>>, vector<256x1024xf32>
    %cst_6 = arith.constant dense<0.000000e+00> : vector<128x1024xf32>
    %6 = tpu.matmul %4, %5, %cst_6 {dimension_numbers = #tpu.dot_dimension_numbers<[1], [0], [0], [1], [0, 0, 1, 1], [], []>} : vector<128x256xf32>, vector<256x1024xf32>, vector<128x1024xf32> -> vector<128x1024xf32>
    %c0_7 = arith.constant 0 : index
    %c0_8 = arith.constant 0 : index
    %7 = vector.load %arg4[%c0_7, %c0_8] : memref<128x1xf32, #tpu.memory_space<vmem>>, vector<128x1xf32>
    %8 = vector.broadcast %7 : vector<128x1xf32> to vector<128x1024xf32>
    %9 = arith.addf %6, %8 : vector<128x1024xf32>
    %c0_9 = arith.constant 0 : index
    %c0_10 = arith.constant 0 : index
    %c0_11 = arith.constant 0 : index
    %10 = vector.load %arg7[%c0_9, %c0_10, %c0_11] : memref<1x256x1024xf32, #tpu.memory_space<vmem>>, vector<1x128x1024xf32>
    %11 = vector.shape_cast %10 : vector<1x128x1024xf32> to vector<128x1024xf32>
    %12 = vector.shape_cast %9 : vector<128x1024xf32> to vector<1x128x1024xf32>
    tpu.vector_store %arg7[%c0_9, %c0_10, %c0_11], %12 {strides = array<i32>} : memref<1x256x1024xf32, #tpu.memory_space<vmem>>, vector<1x128x1024xf32>,
    %c0_12 = arith.constant 0 : index
    %c0_13 = arith.constant 0 : index
    %c0_14 = arith.constant 0 : index
    %13 = vector.load %arg6[%c0_12, %c0_13, %c0_14] : memref<1x128x1024xf32, #tpu.memory_space<vmem>>, vector<1x128x1024xf32>
    %14 = vector.shape_cast %13 : vector<1x128x1024xf32> to vector<128x1024xf32>
    %c0_15 = arith.constant 0 : index
    %c128 = arith.constant 128 : index
    %c0_16 = arith.constant 0 : index
    %15 = vector.load %arg7[%c0_15, %c128, %c0_16] : memref<1x256x1024xf32, #tpu.memory_space<vmem>>, vector<1x128x1024xf32>
    %16 = vector.shape_cast %15 : vector<1x128x1024xf32> to vector<128x1024xf32>
    %17 = vector.shape_cast %14 : vector<128x1024xf32> to vector<1x128x1024xf32>
    tpu.vector_store %arg7[%c0_15, %c128, %c0_16], %17 {strides = array<i32>} : memref<1x256x1024xf32, #tpu.memory_space<vmem>>, vector<1x128x1024xf32>,
    return
  }
  func.func @transform_0(%arg0: i32, %arg1: i32) -> (i32, i32, i32) {
    %c0_i32 = arith.constant 0 : i32
    %c0_i32_0 = arith.constant 0 : i32
    return %arg0, %c0_i32, %arg1 : i32, i32, i32
  }
  func.func @transform_1(%arg0: i32, %arg1: i32) -> (i32, i32) {
    %c0_i32 = arith.constant 0 : i32
    %c0_i32_0 = arith.constant 0 : i32
    %c0_i32_1 = arith.constant 0 : i32
    return %c0_i32, %c0_i32_0 : i32, i32
  }
  func.func @transform_2(%arg0: i32, %arg1: i32) -> (i32, i32) {
    %c0_i32 = arith.constant 0 : i32
    %c0_i32_0 = arith.constant 0 : i32
    %c0_i32_1 = arith.constant 0 : i32
    return %c0_i32, %c0_i32_0 : i32, i32
  }
  func.func @transform_3(%arg0: i32, %arg1: i32) -> (i32, i32) {
    %c0_i32 = arith.constant 0 : i32
    %c0_i32_0 = arith.constant 0 : i32
    %c0_i32_1 = arith.constant 0 : i32
    return %c0_i32, %c0_i32_0 : i32, i32
  }
  func.func @transform_4(%arg0: i32, %arg1: i32) -> (i32, i32, i32) {
    %c0_i32 = arith.constant 0 : i32
    %c0_i32_0 = arith.constant 0 : i32
    return %arg0, %c0_i32, %arg1 : i32, i32, i32
  }
  func.func @transform_5(%arg0: i32, %arg1: i32) -> (i32, i32, i32) {
    %c0_i32 = arith.constant 0 : i32
    %c0_i32_0 = arith.constant 0 : i32
    return %arg0, %c0_i32, %arg1 : i32, i32, i32
  }
}

</mosaic_0001>

<bundles_post_ra>
// kernel: upsampling_forward.1
= control target key start
LH: loop header
LB: loop body
LE: loop exit
PB: predicated region body
PF: predicated region fallthrough
CT: control target
= control target key end

     0   :  { %s2516_s18 = smov 0   ;;  %s2518_s19 = smov 0   ;;  %s4350_s0 = inlined_call_operand.vmem [shape: f32[2,256,256], index: 0, kind: input, shape index: {}]   ;;  %s4351_s1 = inlined_call_operand.vmem [shape: bf16[128,256], index: 1, kind: input, shape index: {}]   ;;  %s4352_s2 = inlined_call_operand.vmem [shape: f32[128,1], index: 2, kind: input, shape index: {}]   ;;  %s4353_s3 = inlined_call_operand.vmem [shape: f32[256,1024], index: 3, kind: input, shape index: {}]   ;;  %s4354_s4 = inlined_call_operand.vmem [shape: f32[2,128,1024], index: 4, kind: input, shape index: {}]   ;;  %s4355_s5 = inlined_call_operand.vmem [shape: f32[2,256,1024], index: 5, kind: output, shape index: {}]  }
   0x1   :  { %s2520_s20 = smov 0  }
   0x2 LB: > { %s27_s21 = sadd.s32 1, %s2479_s19  ;;  %p2094_p0 = scmp.ge.s32.totalorder %s2483_s20, 1  ;;  %s2483_s20 = sphi %s2520_s20, %s15_s20   ;;  %s2479_s19 = sphi %s2518_s19, %s4393_s19   ;;  %s2475_s18 = sphi %s2516_s18, %s4392_s18  }
   0x3   : > { %p29_p1 = scmp.ge.s32.totalorder %s27_s21, 2  ;;  %p225_p2 = scmp.lt.s32.totalorder %s2483_s20, 3 }
   0x5   : > { %s4395_s21 = smov (%p29_p1, %s27_s21), 0  ;;  %p226_p3 = pnand %p2094_p0, %p225_p2 }
   0x7   : > { %229 = sbr.rel (%p226_p3) target bundleno = 735 (0x2df), region = 40 }
   0xe   : > { %p271_p4 = scmp.lt.s32.totalorder %s2475_s18, 1  ;;  %v2439_v0 = vld [vmem:[%s4351_s1 + $0x4] ss:$8 sps:$4 sm:$0xff]  }
   0xf   : > { %524 = vmatprep.mubr.bf16.mxu0 %v2439_v0 }
  0x10   : > { %s4397_s18 = smov (!%p271_p4, %s2475_s18), 1 }
  0x11   : > { %s2119_s24 = sshll.u32 %s4397_s18, 9  ;;  %s2120_s25 = sshll.u32 %s4397_s18, 10 }
  0x12   : > { %s2540_s28 = scalar_lea.vmem %s4350_s0, %s2119_s24  ;;  %s2545_s6 = scalar_lea.vmem %s4354_s4, %s2120_s25 }
  0x13   : > { %s2121_s7 = sshll.u32 %s4397_s18, 11  ;;  %v301_v1 = vld [vmem:[%s2540_s28 + $0x8] sm:$0xff]  ;;  %v303_v2 = vld [vmem:[%s2540_s28 + $0x18] sm:$0xff]  ;;  %v1729_v3 = vld [vmem:[%s2545_s6] sm:$0xff] }
  0x14   : > { %s2553_s10 = scalar_lea.vmem %s4355_s5, %s2121_s7  ;;  %v365_v4 = vpack.c.bf16 %v303_v2, %v301_v1  ;;  %v1730_v5 = vld [vmem:[%s2545_s6 + $0x8] sm:$0xff]  ;;  %v1731_v6 = vld [vmem:[%s2545_s6 + $0x10] sm:$0xff]  ;;  %v1732_v7 = vld [vmem:[%s2545_s6 + $0x18] sm:$0xff] }
  0x15   : > { %v1733_v8 = vld [vmem:[%s2545_s6 + $0x20] sm:$0xff]  ;;  %v1734_v9 = vld [vmem:[%s2545_s6 + $0x28] sm:$0xff]  ;;  %v1735_v10 = vld [vmem:[%s2545_s6 + $0x30] sm:$0xff]  ;;  %1857 = vst [vmem:[%s2553_s10 + $0x400] sm:$0xff] %v1729_v3 }
  0x16   : > { %1858 = vst [vmem:[%s2553_s10 + $0x408] sm:$0xff] %v1730_v5  ;;  %1859 = vst [vmem:[%s2553_s10 + $0x410] sm:$0xff] %v1731_v6  ;;  %492 = vmatprep.subr.bf16.mxu0 %v365_v4  ;;  %v1736_v11 = vld [vmem:[%s2545_s6 + $0x38] sm:$0xff]  ;;  %v1737_v12 = vld [vmem:[%s2545_s6 + $0x40] sm:$0xff] }
  0x17   : > { %1860 = vst [vmem:[%s2553_s10 + $0x418] sm:$0xff] %v1732_v7  ;;  %v1738_v13 = vld [vmem:[%s2545_s6 + $0x48] sm:$0xff]  ;;  %1861 = vst [vmem:[%s2553_s10 + $0x420] sm:$0xff] %v1733_v8  ;;  %v1739_v14 = vld [vmem:[%s2545_s6 + $0x50] sm:$0xff] }
  0x18   : > { %1862 = vst [vmem:[%s2553_s10 + $0x428] sm:$0xff] %v1734_v9  ;;  %1863 = vst [vmem:[%s2553_s10 + $0x430] sm:$0xff] %v1735_v10  ;;  %v1740_v15 = vld [vmem:[%s2545_s6 + $0x58] sm:$0xff]  ;;  %v1741_v16 = vld [vmem:[%s2545_s6 + $0x60] sm:$0xff] }
  0x19   : > { %1864 = vst [vmem:[%s2553_s10 + $0x438] sm:$0xff] %v1736_v11  ;;  %1865 = vst [vmem:[%s2553_s10 + $0x440] sm:$0xff] %v1737_v12  ;;  %v1742_v17 = vld [vmem:[%s2545_s6 + $0x68] sm:$0xff]  ;;  %v1743_v18 = vld [vmem:[%s2545_s6 + $0x70] sm:$0xff] }
  0x1a   : > { %1866 = vst [vmem:[%s2553_s10 + $0x448] sm:$0xff] %v1738_v13  ;;  %v1744_v19 = vld [vmem:[%s2545_s6 + $0x78] sm:$0xff]  ;;  %1867 = vst [vmem:[%s2553_s10 + $0x450] sm:$0xff] %v1739_v14  ;;  %v1745_v20 = vld [vmem:[%s2545_s6 + $0x80] sm:$0xff] }
  0x1b   : > { %1868 = vst [vmem:[%s2553_s10 + $0x458] sm:$0xff] %v1740_v15  ;;  %1869 = vst [vmem:[%s2553_s10 + $0x460] sm:$0xff] %v1741_v16  ;;  %v1746_v21 = vld [vmem:[%s2545_s6 + $0x88] sm:$0xff]  ;;  %v1747_v22 = vld [vmem:[%s2545_s6 + $0x90] sm:$0xff] }
  0x1c   : > { %1870 = vst [vmem:[%s2553_s10 + $0x468] sm:$0xff] %v1742_v17  ;;  %1871 = vst [vmem:[%s2553_s10 + $0x470] sm:$0xff] %v1743_v18  ;;  %v1748_v23 = vld [vmem:[%s2545_s6 + $0x98] sm:$0xff]  ;;  %v1749_v24 = vld [vmem:[%s2545_s6 + $0xa0] sm:$0xff] }
  0x1d   : > { %1872 = vst [vmem:[%s2553_s10 + $0x478] sm:$0xff] %v1744_v19  ;;  %v1750_v25 = vld [vmem:[%s2545_s6 + $0xa8] sm:$0xff]  ;;  %1873 = vst [vmem:[%s2553_s10 + $0x480] sm:$0xff] %v1745_v20  ;;  %v1751_v26 = vld [vmem:[%s2545_s6 + $0xb0] sm:$0xff] }
  0x1e   : > { %1874 = vst [vmem:[%s2553_s10 + $0x488] sm:$0xff] %v1746_v21  ;;  %1875 = vst [vmem:[%s2553_s10 + $0x490] sm:$0xff] %v1747_v22  ;;  %v1752_v27 = vld [vmem:[%s2545_s6 + $0xb8] sm:$0xff]  ;;  %v1753_v28 = vld [vmem:[%s2545_s6 + $0xc0] sm:$0xff] }
  0x1f   : > { %1876 = vst [vmem:[%s2553_s10 + $0x498] sm:$0xff] %v1748_v23  ;;  %1877 = vst [vmem:[%s2553_s10 + $0x4a0] sm:$0xff] %v1749_v24  ;;  %v1754_v29 = vld [vmem:[%s2545_s6 + $0xc8] sm:$0xff]  ;;  %v1755_v30 = vld [vmem:[%s2545_s6 + $0xd0] sm:$0xff] }
  0x20   : > { %1878 = vst [vmem:[%s2553_s10 + $0x4a8] sm:$0xff] %v1750_v25  ;;  %v1756_v31 = vld [vmem:[%s2545_s6 + $0xd8] sm:$0xff]  ;;  %1879 = vst [vmem:[%s2553_s10 + $0x4b0] sm:$0xff] %v1751_v26  ;;  %v1757_v32 = vld [vmem:[%s2545_s6 + $0xe0] sm:$0xff] }
  0x21   : > { %1880 = vst [vmem:[%s2553_s10 + $0x4b8] sm:$0xff] %v1752_v27  ;;  %1881 = vst [vmem:[%s2553_s10 + $0x4c0] sm:$0xff] %v1753_v28  ;;  %v1758_v33 = vld [vmem:[%s2545_s6 + $0xe8] sm:$0xff]  ;;  %v1759_v34 = vld [vmem:[%s2545_s6 + $0xf0] sm:$0xff] }
  0x22   : > { %1882 = vst [vmem:[%s2553_s10 + $0x4c8] sm:$0xff] %v1754_v29  ;;  %1883 = vst [vmem:[%s2553_s10 + $0x4d0] sm:$0xff] %v1755_v30  ;;  %v1760_v35 = vld [vmem:[%s2545_s6 + $0xf8] sm:$0xff]  ;;  %v1761_v36 = vld [vmem:[%s2545_s6 + $0x100] sm:$0xff] }
  0x23   : > { %1884 = vst [vmem:[%s2553_s10 + $0x4d8] sm:$0xff] %v1756_v31  ;;  %v1762_v37 = vld [vmem:[%s2545_s6 + $0x108] sm:$0xff]  ;;  %1885 = vst [vmem:[%s2553_s10 + $0x4e0] sm:$0xff] %v1757_v32  ;;  %v1763_v38 = vld [vmem:[%s2545_s6 + $0x110] sm:$0xff] }
  0x24   : > { %1886 = vst [vmem:[%s2553_s10 + $0x4e8] sm:$0xff] %v1758_v33  ;;  %1887 = vst [vmem:[%s2553_s10 + $0x4f0] sm:$0xff] %v1759_v34  ;;  %v1764_v39 = vld [vmem:[%s2545_s6 + $0x118] sm:$0xff]  ;;  %v1765_v40 = vld [vmem:[%s2545_s6 + $0x120] sm:$0xff] }
  0x25   : > { %1888 = vst [vmem:[%s2553_s10 + $0x4f8] sm:$0xff] %v1760_v35  ;;  %1889 = vst [vmem:[%s2553_s10 + $0x500] sm:$0xff] %v1761_v36  ;;  %v1766_v41 = vld [vmem:[%s2545_s6 + $0x128] sm:$0xff]  ;;  %v1767_v42 = vld [vmem:[%s2545_s6 + $0x130] sm:$0xff] }
  0x26   : > { %1890 = vst [vmem:[%s2553_s10 + $0x508] sm:$0xff] %v1762_v37  ;;  %v1768_v43 = vld [vmem:[%s2545_s6 + $0x138] sm:$0xff]  ;;  %1891 = vst [vmem:[%s2553_s10 + $0x510] sm:$0xff] %v1763_v38  ;;  %v1769_v44 = vld [vmem:[%s2545_s6 + $0x140] sm:$0xff] }
  0x27   : > { %1892 = vst [vmem:[%s2553_s10 + $0x518] sm:$0xff] %v1764_v39  ;;  %1893 = vst [vmem:[%s2553_s10 + $0x520] sm:$0xff] %v1765_v40  ;;  %v1770_v45 = vld [vmem:[%s2545_s6 + $0x148] sm:$0xff]  ;;  %v1771_v46 = vld [vmem:[%s2545_s6 + $0x150] sm:$0xff] }
  0x28   : > { %1894 = vst [vmem:[%s2553_s10 + $0x528] sm:$0xff] %v1766_v41  ;;  %1895 = vst [vmem:[%s2553_s10 + $0x530] sm:$0xff] %v1767_v42  ;;  %v1772_v47 = vld [vmem:[%s2545_s6 + $0x158] sm:$0xff]  ;;  %v1773_v48 = vld [vmem:[%s2545_s6 + $0x160] sm:$0xff] }
  0x29   : > { %1896 = vst [vmem:[%s2553_s10 + $0x538] sm:$0xff] %v1768_v43  ;;  %v1774_v49 = vld [vmem:[%s2545_s6 + $0x168] sm:$0xff]  ;;  %1897 = vst [vmem:[%s2553_s10 + $0x540] sm:$0xff] %v1769_v44  ;;  %v1775_v50 = vld [vmem:[%s2545_s6 + $0x170] sm:$0xff] }
  0x2a   : > { %1898 = vst [vmem:[%s2553_s10 + $0x548] sm:$0xff] %v1770_v45  ;;  %1899 = vst [vmem:[%s2553_s10 + $0x550] sm:$0xff] %v1771_v46  ;;  %v1776_v51 = vld [vmem:[%s2545_s6 + $0x178] sm:$0xff]  ;;  %v1777_v52 = vld [vmem:[%s2545_s6 + $0x180] sm:$0xff] }
  0x2b   : > { %1900 = vst [vmem:[%s2553_s10 + $0x558] sm:$0xff] %v1772_v47  ;;  %1901 = vst [vmem:[%s2553_s10 + $0x560] sm:$0xff] %v1773_v48  ;;  %v1778_v53 = vld [vmem:[%s2545_s6 + $0x188] sm:$0xff]  ;;  %v1779_v54 = vld [vmem:[%s2545_s6 + $0x190] sm:$0xff] }
  0x2c   : > { %1902 = vst [vmem:[%s2553_s10 + $0x568] sm:$0xff] %v1774_v49  ;;  %v1780_v55 = vld [vmem:[%s2545_s6 + $0x198] sm:$0xff]  ;;  %1903 = vst [vmem:[%s2553_s10 + $0x570] sm:$0xff] %v1775_v50  ;;  %v1781_v56 = vld [vmem:[%s2545_s6 + $0x1a0] sm:$0xff] }
  0x2d   : > { %1904 = vst [vmem:[%s2553_s10 + $0x578] sm:$0xff] %v1776_v51  ;;  %1905 = vst [vmem:[%s2553_s10 + $0x580] sm:$0xff] %v1777_v52  ;;  %v1782_v57 = vld [vmem:[%s2545_s6 + $0x1a8] sm:$0xff]  ;;  %v1783_v58 = vld [vmem:[%s2545_s6 + $0x1b0] sm:$0xff] }
  0x2e   : > { %1906 = vst [vmem:[%s2553_s10 + $0x588] sm:$0xff] %v1778_v53  ;;  %1907 = vst [vmem:[%s2553_s10 + $0x590] sm:$0xff] %v1779_v54  ;;  %v1784_v59 = vld [vmem:[%s2545_s6 + $0x1b8] sm:$0xff]  ;;  %v1785_v60 = vld [vmem:[%s2545_s6 + $0x1c0] sm:$0xff] }
  0x2f   : > { %1908 = vst [vmem:[%s2553_s10 + $0x598] sm:$0xff] %v1780_v55  ;;  %v1786_v61 = vld [vmem:[%s2545_s6 + $0x1c8] sm:$0xff]  ;;  %1909 = vst [vmem:[%s2553_s10 + $0x5a0] sm:$0xff] %v1781_v56  ;;  %v1787_v62 = vld [vmem:[%s2545_s6 + $0x1d0] sm:$0xff] }
  0x30   : > { %1910 = vst [vmem:[%s2553_s10 + $0x5a8] sm:$0xff] %v1782_v57  ;;  %1911 = vst [vmem:[%s2553_s10 + $0x5b0] sm:$0xff] %v1783_v58  ;;  %v1788_v63 = vld [vmem:[%s2545_s6 + $0x1d8] sm:$0xff]  ;;  %v1789_v0 = vld [vmem:[%s2545_s6 + $0x1e0] sm:$0xff] }
  0x31   : > { %1912 = vst [vmem:[%s2553_s10 + $0x5b8] sm:$0xff] %v1784_v59  ;;  %1913 = vst [vmem:[%s2553_s10 + $0x5c0] sm:$0xff] %v1785_v60  ;;  %v1790_v1 = vld [vmem:[%s2545_s6 + $0x1e8] sm:$0xff]  ;;  %v1791_v2 = vld [vmem:[%s2545_s6 + $0x1f0] sm:$0xff] }
  0x32   : > { %1914 = vst [vmem:[%s2553_s10 + $0x5c8] sm:$0xff] %v1786_v61  ;;  %v1792_v3 = vld [vmem:[%s2545_s6 + $0x1f8] sm:$0xff]  ;;  %1915 = vst [vmem:[%s2553_s10 + $0x5d0] sm:$0xff] %v1787_v62  ;;  %v1793_v4 = vld [vmem:[%s2545_s6 + $0x200] sm:$0xff] }
  0x33   : > { %1916 = vst [vmem:[%s2553_s10 + $0x5d8] sm:$0xff] %v1788_v63  ;;  %1917 = vst [vmem:[%s2553_s10 + $0x5e0] sm:$0xff] %v1789_v0  ;;  %v1794_v5 = vld [vmem:[%s2545_s6 + $0x208] sm:$0xff]  ;;  %v1795_v6 = vld [vmem:[%s2545_s6 + $0x210] sm:$0xff] }
  0x34   : > { %1918 = vst [vmem:[%s2553_s10 + $0x5e8] sm:$0xff] %v1790_v1  ;;  %1919 = vst [vmem:[%s2553_s10 + $0x5f0] sm:$0xff] %v1791_v2  ;;  %v1796_v7 = vld [vmem:[%s2545_s6 + $0x218] sm:$0xff]  ;;  %v1797_v8 = vld [vmem:[%s2545_s6 + $0x220] sm:$0xff] }
  0x35   : > { %1920 = vst [vmem:[%s2553_s10 + $0x5f8] sm:$0xff] %v1792_v3  ;;  %v1798_v9 = vld [vmem:[%s2545_s6 + $0x228] sm:$0xff]  ;;  %1921 = vst [vmem:[%s2553_s10 + $0x600] sm:$0xff] %v1793_v4  ;;  %v1799_v10 = vld [vmem:[%s2545_s6 + $0x230] sm:$0xff] }
  0x36   : > { %1922 = vst [vmem:[%s2553_s10 + $0x608] sm:$0xff] %v1794_v5  ;;  %1923 = vst [vmem:[%s2553_s10 + $0x610] sm:$0xff] %v1795_v6  ;;  %v1800_v11 = vld [vmem:[%s2545_s6 + $0x238] sm:$0xff]  ;;  %v1801_v12 = vld [vmem:[%s2545_s6 + $0x240] sm:$0xff] }
  0x37   : > { %1924 = vst [vmem:[%s2553_s10 + $0x618] sm:$0xff] %v1796_v7  ;;  %1925 = vst [vmem:[%s2553_s10 + $0x620] sm:$0xff] %v1797_v8  ;;  %v1802_v13 = vld [vmem:[%s2545_s6 + $0x248] sm:$0xff]  ;;  %v1803_v14 = vld [vmem:[%s2545_s6 + $0x250] sm:$0xff] }
  0x38   : > { %1926 = vst [vmem:[%s2553_s10 + $0x628] sm:$0xff] %v1798_v9  ;;  %v1804_v15 = vld [vmem:[%s2545_s6 + $0x258] sm:$0xff]  ;;  %1927 = vst [vmem:[%s2553_s10 + $0x630] sm:$0xff] %v1799_v10  ;;  %v1805_v16 = vld [vmem:[%s2545_s6 + $0x260] sm:$0xff] }
  0x39   : > { %1928 = vst [vmem:[%s2553_s10 + $0x638] sm:$0xff] %v1800_v11  ;;  %1929 = vst [vmem:[%s2553_s10 + $0x640] sm:$0xff] %v1801_v12  ;;  %v1806_v17 = vld [vmem:[%s2545_s6 + $0x268] sm:$0xff]  ;;  %v1807_v18 = vld [vmem:[%s2545_s6 + $0x270] sm:$0xff] }
  0x3a   : > { %1930 = vst [vmem:[%s2553_s10 + $0x648] sm:$0xff] %v1802_v13  ;;  %1931 = vst [vmem:[%s2553_s10 + $0x650] sm:$0xff] %v1803_v14  ;;  %v1808_v19 = vld [vmem:[%s2545_s6 + $0x278] sm:$0xff]  ;;  %v1809_v20 = vld [vmem:[%s2545_s6 + $0x280] sm:$0xff] }
  0x3b   : > { %1932 = vst [vmem:[%s2553_s10 + $0x658] sm:$0xff] %v1804_v15  ;;  %v1810_v21 = vld [vmem:[%s2545_s6 + $0x288] sm:$0xff]  ;;  %1933 = vst [vmem:[%s2553_s10 + $0x660] sm:$0xff] %v1805_v16  ;;  %v1811_v22 = vld [vmem:[%s2545_s6 + $0x290] sm:$0xff] }
  0x3c   : > { %1934 = vst [vmem:[%s2553_s10 + $0x668] sm:$0xff] %v1806_v17  ;;  %1935 = vst [vmem:[%s2553_s10 + $0x670] sm:$0xff] %v1807_v18  ;;  %v1812_v23 = vld [vmem:[%s2545_s6 + $0x298] sm:$0xff]  ;;  %v1813_v24 = vld [vmem:[%s2545_s6 + $0x2a0] sm:$0xff] }
  0x3d   : > { %1936 = vst [vmem:[%s2553_s10 + $0x678] sm:$0xff] %v1808_v19  ;;  %1937 = vst [vmem:[%s2553_s10 + $0x680] sm:$0xff] %v1809_v20  ;;  %v1814_v25 = vld [vmem:[%s2545_s6 + $0x2a8] sm:$0xff]  ;;  %v1815_v26 = vld [vmem:[%s2545_s6 + $0x2b0] sm:$0xff] }
  0x3e   : > { %1938 = vst [vmem:[%s2553_s10 + $0x688] sm:$0xff] %v1810_v21  ;;  %v1816_v27 = vld [vmem:[%s2545_s6 + $0x2b8] sm:$0xff]  ;;  %1939 = vst [vmem:[%s2553_s10 + $0x690] sm:$0xff] %v1811_v22  ;;  %v1817_v28 = vld [vmem:[%s2545_s6 + $0x2c0] sm:$0xff] }
  0x3f   : > { %1940 = vst [vmem:[%s2553_s10 + $0x698] sm:$0xff] %v1812_v23  ;;  %1941 = vst [vmem:[%s2553_s10 + $0x6a0] sm:$0xff] %v1813_v24  ;;  %v1818_v29 = vld [vmem:[%s2545_s6 + $0x2c8] sm:$0xff]  ;;  %v1819_v30 = vld [vmem:[%s2545_s6 + $0x2d0] sm:$0xff] }
  0x40   : > { %1942 = vst [vmem:[%s2553_s10 + $0x6a8] sm:$0xff] %v1814_v25  ;;  %1943 = vst [vmem:[%s2553_s10 + $0x6b0] sm:$0xff] %v1815_v26  ;;  %v1820_v31 = vld [vmem:[%s2545_s6 + $0x2d8] sm:$0xff]  ;;  %v1821_v32 = vld [vmem:[%s2545_s6 + $0x2e0] sm:$0xff] }
  0x41   : > { %1944 = vst [vmem:[%s2553_s10 + $0x6b8] sm:$0xff] %v1816_v27  ;;  %v1822_v33 = vld [vmem:[%s2545_s6 + $0x2e8] sm:$0xff]  ;;  %1945 = vst [vmem:[%s2553_s10 + $0x6c0] sm:$0xff] %v1817_v28  ;;  %v1823_v34 = vld [vmem:[%s2545_s6 + $0x2f0] sm:$0xff] }
  0x42   : > { %1946 = vst [vmem:[%s2553_s10 + $0x6c8] sm:$0xff] %v1818_v29  ;;  %1947 = vst [vmem:[%s2553_s10 + $0x6d0] sm:$0xff] %v1819_v30  ;;  %v1824_v35 = vld [vmem:[%s2545_s6 + $0x2f8] sm:$0xff]  ;;  %v1825_v36 = vld [vmem:[%s2545_s6 + $0x300] sm:$0xff] }
  0x43   : > { %1948 = vst [vmem:[%s2553_s10 + $0x6d8] sm:$0xff] %v1820_v31  ;;  %1949 = vst [vmem:[%s2553_s10 + $0x6e0] sm:$0xff] %v1821_v32  ;;  %v1826_v37 = vld [vmem:[%s2545_s6 + $0x308] sm:$0xff]  ;;  %v1827_v38 = vld [vmem:[%s2545_s6 + $0x310] sm:$0xff] }
  0x44   : > { %1950 = vst [vmem:[%s2553_s10 + $0x6e8] sm:$0xff] %v1822_v33  ;;  %v1828_v39 = vld [vmem:[%s2545_s6 + $0x318] sm:$0xff]  ;;  %1951 = vst [vmem:[%s2553_s10 + $0x6f0] sm:$0xff] %v1823_v34  ;;  %v1829_v40 = vld [vmem:[%s2545_s6 + $0x320] sm:$0xff] }
  0x45   : > { %1952 = vst [vmem:[%s2553_s10 + $0x6f8] sm:$0xff] %v1824_v35  ;;  %1953 = vst [vmem:[%s2553_s10 + $0x700] sm:$0xff] %v1825_v36  ;;  %v1830_v41 = vld [vmem:[%s2545_s6 + $0x328] sm:$0xff]  ;;  %v1831_v42 = vld [vmem:[%s2545_s6 + $0x330] sm:$0xff] }
  0x46   : > { %1954 = vst [vmem:[%s2553_s10 + $0x708] sm:$0xff] %v1826_v37  ;;  %1955 = vst [vmem:[%s2553_s10 + $0x710] sm:$0xff] %v1827_v38  ;;  %v1832_v43 = vld [vmem:[%s2545_s6 + $0x338] sm:$0xff]  ;;  %v1833_v44 = vld [vmem:[%s2545_s6 + $0x340] sm:$0xff] }
  0x47   : > { %1956 = vst [vmem:[%s2553_s10 + $0x718] sm:$0xff] %v1828_v39  ;;  %v1834_v45 = vld [vmem:[%s2545_s6 + $0x348] sm:$0xff]  ;;  %1957 = vst [vmem:[%s2553_s10 + $0x720] sm:$0xff] %v1829_v40  ;;  %v1835_v46 = vld [vmem:[%s2545_s6 + $0x350] sm:$0xff] }
  0x48   : > { %1958 = vst [vmem:[%s2553_s10 + $0x728] sm:$0xff] %v1830_v41  ;;  %1959 = vst [vmem:[%s2553_s10 + $0x730] sm:$0xff] %v1831_v42  ;;  %v1836_v47 = vld [vmem:[%s2545_s6 + $0x358] sm:$0xff]  ;;  %v1837_v48 = vld [vmem:[%s2545_s6 + $0x360] sm:$0xff] }
  0x49   : > { %1960 = vst [vmem:[%s2553_s10 + $0x738] sm:$0xff] %v1832_v43  ;;  %1961 = vst [vmem:[%s2553_s10 + $0x740] sm:$0xff] %v1833_v44  ;;  %v1838_v49 = vld [vmem:[%s2545_s6 + $0x368] sm:$0xff]  ;;  %v1839_v50 = vld [vmem:[%s2545_s6 + $0x370] sm:$0xff] }
  0x4a   : > { %1962 = vst [vmem:[%s2553_s10 + $0x748] sm:$0xff] %v1834_v45  ;;  %v1840_v51 = vld [vmem:[%s2545_s6 + $0x378] sm:$0xff]  ;;  %1963 = vst [vmem:[%s2553_s10 + $0x750] sm:$0xff] %v1835_v46  ;;  %v1841_v52 = vld [vmem:[%s2545_s6 + $0x380] sm:$0xff] }
  0x4b   : > { %1964 = vst [vmem:[%s2553_s10 + $0x758] sm:$0xff] %v1836_v47  ;;  %1965 = vst [vmem:[%s2553_s10 + $0x760] sm:$0xff] %v1837_v48  ;;  %v1842_v53 = vld [vmem:[%s2545_s6 + $0x388] sm:$0xff]  ;;  %v1843_v54 = vld [vmem:[%s2545_s6 + $0x390] sm:$0xff] }
  0x4c   : > { %1966 = vst [vmem:[%s2553_s10 + $0x768] sm:$0xff] %v1838_v49  ;;  %1967 = vst [vmem:[%s2553_s10 + $0x770] sm:$0xff] %v1839_v50  ;;  %v1844_v55 = vld [vmem:[%s2545_s6 + $0x398] sm:$0xff]  ;;  %v1845_v56 = vld [vmem:[%s2545_s6 + $0x3a0] sm:$0xff] }
  0x4d   : > { %1968 = vst [vmem:[%s2553_s10 + $0x778] sm:$0xff] %v1840_v51  ;;  %v1846_v57 = vld [vmem:[%s2545_s6 + $0x3a8] sm:$0xff]  ;;  %1969 = vst [vmem:[%s2553_s10 + $0x780] sm:$0xff] %v1841_v52  ;;  %v1847_v58 = vld [vmem:[%s2545_s6 + $0x3b0] sm:$0xff] }
  0x4e   : > { %1970 = vst [vmem:[%s2553_s10 + $0x788] sm:$0xff] %v1842_v53  ;;  %1971 = vst [vmem:[%s2553_s10 + $0x790] sm:$0xff] %v1843_v54  ;;  %v1848_v59 = vld [vmem:[%s2545_s6 + $0x3b8] sm:$0xff]  ;;  %v1849_v60 = vld [vmem:[%s2545_s6 + $0x3c0] sm:$0xff] }
  0x4f   : > { %1972 = vst [vmem:[%s2553_s10 + $0x798] sm:$0xff] %v1844_v55  ;;  %1973 = vst [vmem:[%s2553_s10 + $0x7a0] sm:$0xff] %v1845_v56  ;;  %v1850_v61 = vld [vmem:[%s2545_s6 + $0x3c8] sm:$0xff]  ;;  %v1851_v62 = vld [vmem:[%s2545_s6 + $0x3d0] sm:$0xff] }
  0x50   : > { %1974 = vst [vmem:[%s2553_s10 + $0x7a8] sm:$0xff] %v1846_v57  ;;  %v1852_v63 = vld [vmem:[%s2545_s6 + $0x3d8] sm:$0xff]  ;;  %1975 = vst [vmem:[%s2553_s10 + $0x7b0] sm:$0xff] %v1847_v58  ;;  %v1853_v0 = vld [vmem:[%s2545_s6 + $0x3e0] sm:$0xff] }
  0x51   : > { %1976 = vst [vmem:[%s2553_s10 + $0x7b8] sm:$0xff] %v1848_v59  ;;  %1977 = vst [vmem:[%s2553_s10 + $0x7c0] sm:$0xff] %v1849_v60  ;;  %v1854_v1 = vld [vmem:[%s2545_s6 + $0x3e8] sm:$0xff]  ;;  %v1855_v2 = vld [vmem:[%s2545_s6 + $0x3f0] sm:$0xff] }
  0x52   : > { %1978 = vst [vmem:[%s2553_s10 + $0x7c8] sm:$0xff] %v1850_v61  ;;  %1979 = vst [vmem:[%s2553_s10 + $0x7d0] sm:$0xff] %v1851_v62  ;;  %v1856_v3 = vld [vmem:[%s2545_s6 + $0x3f8] sm:$0xff]  ;;  %v300_v4 = vld [vmem:[%s2540_s28] sm:$0xff] }
  0x53   : > { %1980 = vst [vmem:[%s2553_s10 + $0x7d8] sm:$0xff] %v1852_v63  ;;  %1981 = vst [vmem:[%s2553_s10 + $0x7e0] sm:$0xff] %v1853_v0  ;;  %v302_v5 = vld [vmem:[%s2540_s28 + $0x10] sm:$0xff]  ;;  %v305_v7 = vld [vmem:[%s2540_s28 + $0x28] sm:$0xff] }
  0x54   : > { %1982 = vst [vmem:[%s2553_s10 + $0x7e8] sm:$0xff] %v1854_v1  ;;  %1983 = vst [vmem:[%s2553_s10 + $0x7f0] sm:$0xff] %v1855_v2  ;;  %v364_v6 = vpack.c.bf16 %v302_v5, %v300_v4  ;;  %v307_v8 = vld [vmem:[%s2540_s28 + $0x38] sm:$0xff]  ;;  %v304_v9 = vld [vmem:[%s2540_s28 + $0x20] sm:$0xff] }
  0x55   : > { %1984 = vst [vmem:[%s2553_s10 + $0x7f8] sm:$0xff] %v1856_v3  ;;  %v367_v10 = vpack.c.bf16 %v307_v8, %v305_v7  ;;  %v306_v11 = vld [vmem:[%s2540_s28 + $0x30] sm:$0xff]  ;;  %v309_v12 = vld [vmem:[%s2540_s28 + $0x48] sm:$0xff]  ;;  %v311_v13 = vld [vmem:[%s2540_s28 + $0x58] sm:$0xff] }
  0x56   : > { %493 = vmatpush1.bf16.msra.mxu0 %v364_v6  ;;  %v366_v14 = vpack.c.bf16 %v306_v11, %v304_v9  ;;  %v369_v15 = vpack.c.bf16 %v311_v13, %v309_v12  ;;  %v308_v16 = vld [vmem:[%s2540_s28 + $0x40] sm:$0xff]  ;;  %v310_v17 = vld [vmem:[%s2540_s28 + $0x50] sm:$0xff]  ;;  %v313_v18 = vld [vmem:[%s2540_s28 + $0x68] sm:$0xff] }
  0x57   : > { %494 = vmatprep.subr.bf16.mxu0 %v367_v10  ;;  %v315_v19 = vld [vmem:[%s2540_s28 + $0x78] sm:$0xff]  ;;  %v368_v20 = vpack.c.bf16 %v310_v17, %v308_v16  ;;  %v312_v22 = vld [vmem:[%s2540_s28 + $0x60] sm:$0xff]  ;;  %v314_v23 = vld [vmem:[%s2540_s28 + $0x70] sm:$0xff] }
  0x58   : > { %v371_v21 = vpack.c.bf16 %v315_v19, %v313_v18  ;;  %v317_v24 = vld [vmem:[%s2540_s28 + $0x88] sm:$0xff]  ;;  %v319_v25 = vld [vmem:[%s2540_s28 + $0x98] sm:$0xff]  ;;  %v370_v26 = vpack.c.bf16 %v314_v23, %v312_v22  ;;  %v316_v28 = vld [vmem:[%s2540_s28 + $0x80] sm:$0xff] }
  0x59   : > { %v373_v27 = vpack.c.bf16 %v319_v25, %v317_v24  ;;  %v318_v29 = vld [vmem:[%s2540_s28 + $0x90] sm:$0xff]  ;;  %v321_v30 = vld [vmem:[%s2540_s28 + $0xa8] sm:$0xff]  ;;  %v323_v31 = vld [vmem:[%s2540_s28 + $0xb8] sm:$0xff] }
  0x5a   : > { %495 = vmatpush1.bf16.msra.mxu0 %v366_v14  ;;  %v372_v32 = vpack.c.bf16 %v318_v29, %v316_v28  ;;  %v375_v33 = vpack.c.bf16 %v323_v31, %v321_v30  ;;  %v320_v34 = vld [vmem:[%s2540_s28 + $0xa0] sm:$0xff]  ;;  %v322_v35 = vld [vmem:[%s2540_s28 + $0xb0] sm:$0xff]  ;;  %v325_v36 = vld [vmem:[%s2540_s28 + $0xc8] sm:$0xff] }
  0x5b   : > { %496 = vmatprep.subr.bf16.mxu0 %v369_v15  ;;  %v327_v37 = vld [vmem:[%s2540_s28 + $0xd8] sm:$0xff]  ;;  %v374_v38 = vpack.c.bf16 %v322_v35, %v320_v34  ;;  %v324_v40 = vld [vmem:[%s2540_s28 + $0xc0] sm:$0xff]  ;;  %v326_v41 = vld [vmem:[%s2540_s28 + $0xd0] sm:$0xff] }
  0x5c   : > { %v377_v39 = vpack.c.bf16 %v327_v37, %v325_v36  ;;  %v329_v42 = vld [vmem:[%s2540_s28 + $0xe8] sm:$0xff]  ;;  %v331_v43 = vld [vmem:[%s2540_s28 + $0xf8] sm:$0xff]  ;;  %v376_v44 = vpack.c.bf16 %v326_v41, %v324_v40  ;;  %v328_v45 = vld [vmem:[%s2540_s28 + $0xe0] sm:$0xff] }
  0x5d   : > { %v379_v46 = vpack.c.bf16 %v331_v43, %v329_v42  ;;  %v330_v47 = vld [vmem:[%s2540_s28 + $0xf0] sm:$0xff]  ;;  %v333_v48 = vld [vmem:[%s2540_s28 + $0x108] sm:$0xff]  ;;  %v335_v49 = vld [vmem:[%s2540_s28 + $0x118] sm:$0xff] }
  0x5e   : > { %497 = vmatpush1.bf16.msra.mxu0 %v368_v20  ;;  %v606_v50 = vld [vmem:[%s4353_s3 + $0x8] sm:$0xff]  ;;  %v605_v52 = vld [vmem:[%s4353_s3] sm:$0xff]  ;;  %v378_v54 = vpack.c.bf16 %v330_v47, %v328_v45  ;;  %v334_v56 = vld [vmem:[%s2540_s28 + $0x110] sm:$0xff]  ;;  %v381_v59 = vpack.c.bf16 %v335_v49, %v333_v48 }
  0x5f   : > { %498 = vmatprep.subr.bf16.mxu0 %v371_v21  ;;  %v614_v51 = vld [vmem:[%s4353_s3 + $0x48] sm:$0xff]  ;;  %v613_v53 = vld [vmem:[%s4353_s3 + $0x40] sm:$0xff]  ;;  %v339_v63 = vld [vmem:[%s2540_s28 + $0x138] sm:$0xff] }
  0x60   : > { %v332_v55 = vld [vmem:[%s2540_s28 + $0x100] sm:$0xff]  ;;  %v2122_v57 = vpack.c.bf16 %v614_v51, %v606_v50  ;;  %v2124_v58 = vpack.c.bf16 %v613_v53, %v605_v52  ;;  %v337_v60 = vld [vmem:[%s2540_s28 + $0x128] sm:$0xff]  ;;  %v338_v10 = vld [vmem:[%s2540_s28 + $0x130] sm:$0xff] }
  0x61   : > { %v622_v61 = vld [vmem:[%s4353_s3 + $0x88] sm:$0xff]  ;;  %v621_v1 = vld [vmem:[%s4353_s3 + $0x80] sm:$0xff]  ;;  %v380_v4 = vpack.c.bf16 %v334_v56, %v332_v55  ;;  %v383_v8 = vpack.c.bf16 %v339_v63, %v337_v60  ;;  %v343_v14 = vld [vmem:[%s2540_s28 + $0x158] sm:$0xff] }
  0x62   : > { %499 = vmatpush1.bf16.msra.mxu0 %v370_v26  ;;  %v630_v62 = vld [vmem:[%s4353_s3 + $0xc8] sm:$0xff]  ;;  %2123 = vmatprep.subr.bf16.mxu1 %v2122_v57  ;;  %v629_v2 = vld [vmem:[%s4353_s3 + $0xc0] sm:$0xff]  ;;  %v342_v24 = vld [vmem:[%s2540_s28 + $0x150] sm:$0xff] }
  0x63   : > { %500 = vmatprep.subr.bf16.mxu0 %v373_v27  ;;  %v2126_v0 = vpack.c.bf16 %v630_v62, %v622_v61  ;;  %2125 = vmatpush1.bf16.msra.mxu1 %v2124_v58  ;;  %v2128_v3 = vpack.c.bf16 %v629_v2, %v621_v1  ;;  %v638_v5 = vld [vmem:[%s4353_s3 + $0x108] sm:$0xff]  ;;  %v637_v7 = vld [vmem:[%s4353_s3 + $0x100] sm:$0xff]  ;;  %v347_v28 = vld [vmem:[%s2540_s28 + $0x178] sm:$0xff] }
  0x64   : > { %v646_v6 = vld [vmem:[%s4353_s3 + $0x148] sm:$0xff]  ;;  %v336_v9 = vld [vmem:[%s2540_s28 + $0x120] sm:$0xff]  ;;  %v346_v36 = vld [vmem:[%s2540_s28 + $0x170] sm:$0xff] }
  0x65   : > { %2127 = vmatprep.subr.bf16.mxu1 %v2126_v0  ;;  %v2130_v11 = vpack.c.bf16 %v646_v6, %v638_v5  ;;  %v645_v12 = vld [vmem:[%s4353_s3 + $0x140] sm:$0xff]  ;;  %v341_v13 = vld [vmem:[%s2540_s28 + $0x148] sm:$0xff]  ;;  %v382_v18 = vpack.c.bf16 %v338_v10, %v336_v9  ;;  %v351_v40 = vld [vmem:[%s2540_s28 + $0x198] sm:$0xff] }
  0x66   : > { %501 = vmatpush1.bf16.msra.mxu0 %v372_v32  ;;  %v654_v15 = vld [vmem:[%s4353_s3 + $0x188] sm:$0xff]  ;;  %v2132_v16 = vpack.c.bf16 %v645_v12, %v637_v7  ;;  %v340_v19 = vld [vmem:[%s2540_s28 + $0x140] sm:$0xff]  ;;  %v385_v23 = vpack.c.bf16 %v343_v14, %v341_v13  ;;  %v350_v48 = vld [vmem:[%s2540_s28 + $0x190] sm:$0xff] }
  0x67   : > { %502 = vmatprep.subr.bf16.mxu0 %v375_v33  ;;  %2129 = vmatpush1.bf16.msra.mxu1 %v2128_v3  ;;  %v662_v17 = vld [vmem:[%s4353_s3 + $0x1c8] sm:$0xff]  ;;  %v653_v21 = vld [vmem:[%s4353_s3 + $0x180] sm:$0xff]  ;;  %v384_v30 = vpack.c.bf16 %v342_v24, %v340_v19  ;;  %v355_v52 = vld [vmem:[%s2540_s28 + $0x1b8] sm:$0xff] }
  0x68   : > { %2131 = vmatprep.subr.bf16.mxu1 %v2130_v11  ;;  %v2134_v20 = vpack.c.bf16 %v662_v17, %v654_v15  ;;  %v661_v22 = vld [vmem:[%s4353_s3 + $0x1c0] sm:$0xff]  ;;  %v670_v25 = vld [vmem:[%s4353_s3 + $0x208] sm:$0xff]  ;;  %v354_v60 = vld [vmem:[%s2540_s28 + $0x1b0] sm:$0xff] }
  0x69   : > { %v678_v26 = vld [vmem:[%s4353_s3 + $0x248] sm:$0xff]  ;;  %v2136_v29 = vpack.c.bf16 %v661_v22, %v653_v21  ;;  %v344_v31 = vld [vmem:[%s2540_s28 + $0x160] sm:$0xff]  ;;  %v359_v0 = vld [vmem:[%s2540_s28 + $0x1d8] sm:$0xff] }
  0x6a   : > { %503 = vmatpush1.bf16.msra.mxu0 %v374_v38  ;;  %v345_v27 = vld [vmem:[%s2540_s28 + $0x168] sm:$0xff]  ;;  %v2138_v32 = vpack.c.bf16 %v678_v26, %v670_v25  ;;  %v669_v33 = vld [vmem:[%s4353_s3 + $0x200] sm:$0xff]  ;;  %v386_v42 = vpack.c.bf16 %v346_v36, %v344_v31  ;;  %v363_v12 = vld [vmem:[%s2540_s28 + $0x1f8] sm:$0xff] }
  0x6b   : > { %504 = vmatprep.subr.bf16.mxu0 %v377_v39  ;;  %2133 = vmatpush1.bf16.msra.mxu1 %v2132_v16  ;;  %v677_v34 = vld [vmem:[%s4353_s3 + $0x240] sm:$0xff]  ;;  %v387_v35 = vpack.c.bf16 %v347_v28, %v345_v27  ;;  %v686_v37 = vld [vmem:[%s4353_s3 + $0x288] sm:$0xff]  ;;  %v616_v24 = vld [vmem:[%s4353_s3 + $0x58] sm:$0xff] }
  0x6c   : > { %2135 = vmatprep.subr.bf16.mxu1 %v2134_v20  ;;  %v694_v38 = vld [vmem:[%s4353_s3 + $0x2c8] sm:$0xff]  ;;  %v2140_v41 = vpack.c.bf16 %v677_v34, %v669_v33  ;;  %v348_v43 = vld [vmem:[%s2540_s28 + $0x180] sm:$0xff]  ;;  %v362_v20 = vld [vmem:[%s2540_s28 + $0x1f0] sm:$0xff] }
  0x6d   : > { %v349_v39 = vld [vmem:[%s2540_s28 + $0x188] sm:$0xff]  ;;  %v685_v45 = vld [vmem:[%s4353_s3 + $0x280] sm:$0xff]  ;;  %v607_v31 = vld [vmem:[%s4353_s3 + $0x10] sm:$0xff] }
  0x6e   : > { %505 = vmatpush1.bf16.msra.mxu0 %v376_v44  ;;  %v2142_v44 = vpack.c.bf16 %v694_v38, %v686_v37  ;;  %v389_v47 = vpack.c.bf16 %v351_v40, %v349_v39  ;;  %v702_v49 = vld [vmem:[%s4353_s3 + $0x308] sm:$0xff]  ;;  %v352_v55 = vld [vmem:[%s2540_s28 + $0x1a0] sm:$0xff]  ;;  %v624_v33 = vld [vmem:[%s4353_s3 + $0x98] sm:$0xff] }
  0x6f   : > { %506 = vmatprep.subr.bf16.mxu0 %v379_v46  ;;  %2137 = vmatpush1.bf16.msra.mxu1 %v2136_v29  ;;  %v693_v46 = vld [vmem:[%s4353_s3 + $0x2c0] sm:$0xff]  ;;  %v710_v50 = vld [vmem:[%s4353_s3 + $0x348] sm:$0xff]  ;;  %v390_v2 = vpack.c.bf16 %v354_v60, %v352_v55  ;;  %v632_v34 = vld [vmem:[%s4353_s3 + $0xd8] sm:$0xff] }
  0x70   : > { %2139 = vmatprep.subr.bf16.mxu1 %v2138_v32  ;;  %v353_v51 = vld [vmem:[%s2540_s28 + $0x1a8] sm:$0xff]  ;;  %v2144_v53 = vpack.c.bf16 %v693_v46, %v685_v45  ;;  %v2146_v56 = vpack.c.bf16 %v710_v50, %v702_v49  ;;  %v701_v57 = vld [vmem:[%s4353_s3 + $0x300] sm:$0xff]  ;;  %v615_v32 = vld [vmem:[%s4353_s3 + $0x50] sm:$0xff] }
  0x71   : > { %v709_v58 = vld [vmem:[%s4353_s3 + $0x340] sm:$0xff]  ;;  %v718_v61 = vld [vmem:[%s4353_s3 + $0x388] sm:$0xff]  ;;  %v2440_v38 = vld [vmem:[%s4351_s1 + $0x14] ss:$8 sps:$4 sm:$0xff]   ;;  %v2188_v40 = vpack.c.bf16 %v615_v32, %v607_v31 }
  0x72   : > { %507 = vmatpush1.bf16.msra.mxu0 %v378_v54  ;;  %v388_v54 = vpack.c.bf16 %v350_v48, %v348_v43  ;;  %v726_v62 = vld [vmem:[%s4353_s3 + $0x3c8] sm:$0xff]  ;;  %v2148_v1 = vpack.c.bf16 %v709_v58, %v701_v57  ;;  %v356_v3 = vld [vmem:[%s2540_s28 + $0x1c0] sm:$0xff]  ;;  %v631_v45 = vld [vmem:[%s4353_s3 + $0xd0] sm:$0xff] }
  0x73   : > { %508 = vmatprep.subr.bf16.mxu0 %v381_v59  ;;  %2141 = vmatpush1.bf16.msra.mxu1 %v2140_v41  ;;  %v391_v59 = vpack.c.bf16 %v355_v52, %v353_v51  ;;  %v357_v63 = vld [vmem:[%s2540_s28 + $0x1c8] sm:$0xff]  ;;  %v717_v5 = vld [vmem:[%s4353_s3 + $0x380] sm:$0xff]  ;;  %v623_v41 = vld [vmem:[%s4353_s3 + $0x90] sm:$0xff] }
  0x74   : > { %2143 = vmatprep.subr.bf16.mxu1 %v2142_v44  ;;  %v725_v6 = vld [vmem:[%s4353_s3 + $0x3c0] sm:$0xff]  ;;  %v393_v7 = vpack.c.bf16 %v359_v0, %v357_v63  ;;  %v734_v9 = vld [vmem:[%s4353_s3 + $0x408] sm:$0xff]  ;;  %v2190_v44 = vpack.c.bf16 %v632_v34, %v624_v33  ;;  %v640_v49 = vld [vmem:[%s4353_s3 + $0x118] sm:$0xff]  ;;  %v2192_v52 = vpack.c.bf16 %v631_v45, %v623_v41 }
  0x75   : > { %v742_v10 = vld [vmem:[%s4353_s3 + $0x448] sm:$0xff]  ;;  %v2152_v13 = vpack.c.bf16 %v725_v6, %v717_v5  ;;  %v360_v15 = vld [vmem:[%s2540_s28 + $0x1e0] sm:$0xff]  ;;  %v648_v50 = vld [vmem:[%s4353_s3 + $0x158] sm:$0xff] }
  0x76   : > { %509 = vmatpush1.bf16.msra.mxu0 %v380_v4  ;;  %v2150_v4 = vpack.c.bf16 %v726_v62, %v718_v61  ;;  %v361_v11 = vld [vmem:[%s2540_s28 + $0x1e8] sm:$0xff]  ;;  %v2154_v16 = vpack.c.bf16 %v742_v10, %v734_v9  ;;  %v733_v17 = vld [vmem:[%s4353_s3 + $0x400] sm:$0xff]  ;;  %v394_v26 = vpack.c.bf16 %v362_v20, %v360_v15  ;;  %v639_v57 = vld [vmem:[%s4353_s3 + $0x110] sm:$0xff] }
  0x77   : > { %510 = vmatprep.subr.bf16.mxu0 %v383_v8  ;;  %2145 = vmatpush1.bf16.msra.mxu1 %v2144_v53  ;;  %v358_v8 = vld [vmem:[%s2540_s28 + $0x1d0] sm:$0xff]  ;;  %v395_v19 = vpack.c.bf16 %v363_v12, %v361_v11  ;;  %v750_v21 = vld [vmem:[%s4353_s3 + $0x488] sm:$0xff]  ;;  %v749_v28 = vld [vmem:[%s4353_s3 + $0x480] sm:$0xff] }
  0x78   : > { %2147 = vmatprep.subr.bf16.mxu1 %v2146_v56  ;;  %v392_v14 = vpack.c.bf16 %v358_v8, %v356_v3  ;;  %v758_v22 = vld [vmem:[%s4353_s3 + $0x4c8] sm:$0xff]  ;;  %v757_v29 = vld [vmem:[%s4353_s3 + $0x4c0] sm:$0xff]  ;;  %v2194_v56 = vpack.c.bf16 %v648_v50, %v640_v49  ;;  %v647_v58 = vld [vmem:[%s4353_s3 + $0x150] sm:$0xff] }
  0x79   : > { %v2158_v27 = vpack.c.bf16 %v758_v22, %v750_v21  ;;  %v774_v36 = vld [vmem:[%s4353_s3 + $0x548] sm:$0xff]  ;;  %v2160_v39 = vpack.c.bf16 %v757_v29, %v749_v28  ;;  %v773_v43 = vld [vmem:[%s4353_s3 + $0x540] sm:$0xff]  ;;  %v664_v60 = vld [vmem:[%s4353_s3 + $0x1d8] sm:$0xff] }
  0x7a   : > { %511 = vmatpush1.bf16.msra.mxu0 %v382_v18  ;;  %v741_v18 = vld [vmem:[%s4353_s3 + $0x440] sm:$0xff]  ;;  %v790_v48 = vld [vmem:[%s4353_s3 + $0x5c8] sm:$0xff]  ;;  %v2442_v63 = vld [vmem:[%s4351_s1 + $0x10] ss:$8 sps:$4 sm:$0xff]  }
  0x7b   : > { %512 = vmatprep.subr.bf16.mxu0 %v385_v23  ;;  %2149 = vmatpush1.bf16.msra.mxu1 %v2148_v1  ;;  %v608_v23 = vld [vmem:[%s4353_s3 + $0x18] sm:$0xff]  ;;  %v2156_v25 = vpack.c.bf16 %v741_v18, %v733_v17  ;;  %v2437_v37 = vld [vmem:[%s4351_s1] ss:$8 sps:$4 sm:$0xff]   ;;  %v2443_v0 = vld [vmem:[%s4351_s1 + $0x24] ss:$8 sps:$4 sm:$0xff]  }
  0x7c   : > { %2151 = vmatprep.subr.bf16.mxu1 %v2150_v4  ;;  %v789_v55 = vld [vmem:[%s4353_s3 + $0x5c0] sm:$0xff]  ;;  %v798_v61 = vld [vmem:[%s4353_s3 + $0x608] sm:$0xff]  ;;  %v655_v3 = vld [vmem:[%s4353_s3 + $0x190] sm:$0xff] }
  0x7d   : > { %v806_v62 = vld [vmem:[%s4353_s3 + $0x648] sm:$0xff]  ;;  %v797_v4 = vld [vmem:[%s4353_s3 + $0x600] sm:$0xff]  ;;  %v672_v11 = vld [vmem:[%s4353_s3 + $0x218] sm:$0xff] }
  0x7e   : > { %513 = vmatpush1.bf16.msra.mxu0 %v384_v30  ;;  %v2186_v30 = vpack.c.bf16 %v616_v24, %v608_v23  ;;  %v805_v5 = vld [vmem:[%s4353_s3 + $0x640] sm:$0xff]  ;;  %v2170_v8 = vpack.c.bf16 %v806_v62, %v798_v61  ;;  %v814_v9 = vld [vmem:[%s4353_s3 + $0x688] sm:$0xff]  ;;  %v680_v12 = vld [vmem:[%s4353_s3 + $0x258] sm:$0xff] }
  0x7f   : > { %514 = vmatprep.subr.bf16.mxu0 %v387_v35  ;;  %2153 = vmatpush1.bf16.msra.mxu1 %v2152_v13  ;;  %v766_v35 = vld [vmem:[%s4353_s3 + $0x508] sm:$0xff]  ;;  %v2172_v13 = vpack.c.bf16 %v805_v5, %v797_v4  ;;  %v821_v17 = vld [vmem:[%s4353_s3 + $0x6c0] sm:$0xff]  ;;  %v2202_v18 = vpack.c.bf16 %v680_v12, %v672_v11  ;;  %v679_v20 = vld [vmem:[%s4353_s3 + $0x250] sm:$0xff] }
  0x80   : > { %2155 = vmatprep.subr.bf16.mxu1 %v2154_v16  ;;  %v2162_v46 = vpack.c.bf16 %v774_v36, %v766_v35  ;;  %v822_v10 = vld [vmem:[%s4353_s3 + $0x6c8] sm:$0xff]  ;;  %v813_v16 = vld [vmem:[%s4353_s3 + $0x680] sm:$0xff]  ;;  %v688_v21 = vld [vmem:[%s4353_s3 + $0x298] sm:$0xff] }
  0x81   : > { %v2174_v15 = vpack.c.bf16 %v822_v10, %v814_v9  ;;  %v696_v22 = vld [vmem:[%s4353_s3 + $0x2d8] sm:$0xff]  ;;  %v830_v23 = vld [vmem:[%s4353_s3 + $0x708] sm:$0xff]  ;;  %v687_v29 = vld [vmem:[%s4353_s3 + $0x290] sm:$0xff] }
  0x82   : > { %515 = vmatpush1.bf16.msra.mxu0 %v386_v42  ;;  %v765_v42 = vld [vmem:[%s4353_s3 + $0x500] sm:$0xff]  ;;  %v838_v24 = vld [vmem:[%s4353_s3 + $0x748] sm:$0xff]  ;;  %v2206_v32 = vpack.c.bf16 %v696_v22, %v688_v21  ;;  %v695_v33 = vld [vmem:[%s4353_s3 + $0x2d0] sm:$0xff] }
  0x83   : > { %516 = vmatprep.subr.bf16.mxu0 %v389_v47  ;;  %2157 = vmatpush1.bf16.msra.mxu1 %v2156_v25  ;;  %v782_v47 = vld [vmem:[%s4353_s3 + $0x588] sm:$0xff]  ;;  %v2164_v51 = vpack.c.bf16 %v773_v43, %v765_v42  ;;  %v837_v31 = vld [vmem:[%s4353_s3 + $0x740] sm:$0xff]  ;;  %v2178_v34 = vpack.c.bf16 %v838_v24, %v830_v23  ;;  %v703_v45 = vld [vmem:[%s4353_s3 + $0x310] sm:$0xff] }
  0x84   : > { %2159 = vmatprep.subr.bf16.mxu1 %v2158_v27  ;;  %v2166_v53 = vpack.c.bf16 %v790_v48, %v782_v47  ;;  %v2445_v25 = vld [vmem:[%s4351_s1 + $0x20] ss:$8 sps:$4 sm:$0xff]   ;;  %v2176_v27 = vpack.c.bf16 %v821_v17, %v813_v16  ;;  %v720_v47 = vld [vmem:[%s4353_s3 + $0x398] sm:$0xff]  ;;  %v743_v61 = vld [vmem:[%s4353_s3 + $0x450] sm:$0xff] }
  0x85   : > { %v846_v35 = vld [vmem:[%s4353_s3 + $0x788] sm:$0xff]  ;;  %v845_v42 = vld [vmem:[%s4353_s3 + $0x780] sm:$0xff]  ;;  %v728_v48 = vld [vmem:[%s4353_s3 + $0x3d8] sm:$0xff] }
  0x86   : > { %517 = vmatpush1.bf16.msra.mxu0 %v388_v54  ;;  %v781_v54 = vld [vmem:[%s4353_s3 + $0x580] sm:$0xff]  ;;  %v854_v36 = vld [vmem:[%s4353_s3 + $0x7c8] sm:$0xff]  ;;  %v2448_v49 = vld [vmem:[%s4351_s1 + $0x30] ss:$8 sps:$4 sm:$0xff]  }
  0x87   : > { %518 = vmatprep.subr.bf16.mxu0 %v391_v59  ;;  %2161 = vmatpush1.bf16.msra.mxu1 %v2160_v39  ;;  %v656_v59 = vld [vmem:[%s4353_s3 + $0x198] sm:$0xff]  ;;  %v2168_v1 = vpack.c.bf16 %v789_v55, %v781_v54  ;;  %v2182_v41 = vpack.c.bf16 %v854_v36, %v846_v35  ;;  %v853_v43 = vld [vmem:[%s4353_s3 + $0x7c0] sm:$0xff]  ;;  %v719_v54 = vld [vmem:[%s4353_s3 + $0x390] sm:$0xff] }
  0x88   : > { %2163 = vmatprep.subr.bf16.mxu1 %v2162_v46  ;;  %v2198_v6 = vpack.c.bf16 %v664_v60, %v656_v59  ;;  %v711_v46 = vld [vmem:[%s4353_s3 + $0x350] sm:$0xff]  ;;  %v2184_v50 = vpack.c.bf16 %v853_v43, %v845_v42  ;;  %v752_v62 = vld [vmem:[%s4353_s3 + $0x498] sm:$0xff] }
  0x89   : > { %v727_v55 = vld [vmem:[%s4353_s3 + $0x3d0] sm:$0xff]  ;;  %v784_v12 = vld [vmem:[%s4353_s3 + $0x598] sm:$0xff] }
  0x8a   : > { %519 = vmatpush1.bf16.msra.mxu0 %v390_v2  ;;  %v2196_v2 = vpack.c.bf16 %v647_v58, %v639_v57  ;;  %v744_v57 = vld [vmem:[%s4353_s3 + $0x458] sm:$0xff]  ;;  %v2216_v58 = vpack.c.bf16 %v727_v55, %v719_v54  ;;  %v735_v60 = vld [vmem:[%s4353_s3 + $0x410] sm:$0xff]  ;;  %v861_v54 = vld [vmem:[%s4352_s2] sm:$0xff]  ;;  %v2485_v55 = vmov 0  }
  0x8b   : > { %520 = vmatprep.subr.bf16.mxu0 %v393_v7  ;;  %2165 = vmatpush1.bf16.msra.mxu1 %v2164_v51  ;;  %v663_v7 = vld [vmem:[%s4353_s3 + $0x1d0] sm:$0xff]  ;;  %v2449_v51 = vld [vmem:[%s4351_s1 + $0x44] ss:$8 sps:$4 sm:$0xff]   ;;  %v808_v21 = vld [vmem:[%s4353_s3 + $0x658] sm:$0xff] }
  0x8c   : > { %2167 = vmatprep.subr.bf16.mxu1 %v2166_v53  ;;  %v2214_v53 = vpack.c.bf16 %v728_v48, %v720_v47  ;;  %v751_v4 = vld [vmem:[%s4353_s3 + $0x490] sm:$0xff]  ;;  %v840_v35 = vld [vmem:[%s4353_s3 + $0x758] sm:$0xff]  ;;  %v610_v48 = vld [vmem:[%s4353_s3 + $0x28] sm:$0xff]  ;;  %2435 = vset.pattern.permute.xlu0 %v2485_v55 }
  0x8d   : > { %v759_v5 = vld [vmem:[%s4353_s3 + $0x4d0] sm:$0xff]  ;;  %2436 = vset.pattern.permute.xlu1 %v2485_v55  ;;  %879 = vperm.xlu0 %2435, %v861_v54  }
  0x8e   : > { %521 = vmatpush1.bf16.msra.mxu0 %v392_v14  ;;  %v2200_v14 = vpack.c.bf16 %v663_v7, %v655_v3  ;;  %v776_v7 = vld [vmem:[%s4353_s3 + $0x558] sm:$0xff]  ;;  %v767_v10 = vld [vmem:[%s4353_s3 + $0x510] sm:$0xff] }
  0x8f   : > { %522 = vmatprep.subr.bf16.mxu0 %v395_v19  ;;  %2169 = vmatpush1.bf16.msra.mxu1 %v2168_v1  ;;  %v671_v19 = vld [vmem:[%s4353_s3 + $0x210] sm:$0xff] }
  0x90   : > { %2171 = vmatprep.subr.bf16.mxu1 %v2170_v8  ;;  %v2204_v28 = vpack.c.bf16 %v679_v20, %v671_v19  ;;  %v2452_v1 = vld [vmem:[%s4351_s1 + $0x54] ss:$8 sps:$4 sm:$0xff]   ;;  %v2224_v8 = vpack.c.bf16 %v759_v5, %v751_v4  ;;  %v2460_v42 = vld [vmem:[%s4351_s1 + $0x70] ss:$8 sps:$4 sm:$0xff]  }
  0x91   : > { %v775_v11 = vld [vmem:[%s4353_s3 + $0x550] sm:$0xff]  ;;  %v800_v20 = vld [vmem:[%s4353_s3 + $0x618] sm:$0xff] }
  0x92   : > { %523 = vmatpush1.bf16.msra.mxu0 %v394_v26  ;;  %v2446_v26 = vld [vmem:[%s4351_s1 + $0x34] ss:$8 sps:$4 sm:$0xff]   ;;  %v2228_v16 = vpack.c.bf16 %v775_v11, %v767_v10  ;;  %v2234_v23 = vpack.c.bf16 %v808_v21, %v800_v20 }
  0x93   : > { %2187 = vmatprep.subr.bf16.mxu0 %v2186_v30  ;;  %2173 = vmatpush1.bf16.msra.mxu1 %v2172_v13  ;;  %v829_v30 = vld [vmem:[%s4353_s3 + $0x700] sm:$0xff]  ;;  %v792_v13 = vld [vmem:[%s4353_s3 + $0x5d8] sm:$0xff]  ;;  %v791_v19 = vld [vmem:[%s4353_s3 + $0x5d0] sm:$0xff] }
  0x94   : > { %2175 = vmatprep.subr.bf16.mxu1 %v2174_v15  ;;  %v2180_v39 = vpack.c.bf16 %v837_v31, %v829_v30  ;;  %v2455_v15 = vld [vmem:[%s4351_s1 + $0x64] ss:$8 sps:$4 sm:$0xff]   ;;  %v2230_v17 = vpack.c.bf16 %v792_v13, %v784_v12  ;;  %v799_v24 = vld [vmem:[%s4353_s3 + $0x610] sm:$0xff]  ;;  %v872_v12 = vld [vmem:[%s4352_s2 + $0x58] sm:$0xff] }
  0x95   : > { %525 = vmatmul.mubr.bf16.vlgmr.msra.gmra.mrb[0].mxu0 %v2437_v37  ;;  %v704_v37 = vld [vmem:[%s4353_s3 + $0x318] sm:$0xff]  ;;  %v611_v4 = vld [vmem:[%s4353_s3 + $0x30] sm:$0xff] }
  0x96   : > { %534 = vmatprep.mubr.bf16.mxu0 %v2440_v38  ;;  %2189 = vmatpush1.bf16.msra.mxu0 %v2188_v40  ;;  %v712_v38 = vld [vmem:[%s4353_s3 + $0x358] sm:$0xff]  ;;  %v2208_v40 = vpack.c.bf16 %v695_v33, %v687_v29  ;;  %v823_v33 = vld [vmem:[%s4353_s3 + $0x6d0] sm:$0xff] }
  0x97   : > { %2191 = vmatprep.subr.bf16.mxu0 %v2190_v44  ;;  %2177 = vmatpush1.bf16.msra.mxu1 %v2176_v27  ;;  %v2210_v44 = vpack.c.bf16 %v712_v38, %v704_v37  ;;  %v824_v27 = vld [vmem:[%s4353_s3 + $0x6d8] sm:$0xff]  ;;  %v831_v38 = vld [vmem:[%s4353_s3 + $0x710] sm:$0xff] }
  0x98   : > { %2179 = vmatprep.subr.bf16.mxu1 %v2178_v34  ;;  %v2458_v29 = vld [vmem:[%s4351_s1 + $0x74] ss:$8 sps:$4 sm:$0xff]  }
  0x99   : > { %v832_v34 = vld [vmem:[%s4353_s3 + $0x718] sm:$0xff]  ;;  %v619_v5 = vld [vmem:[%s4353_s3 + $0x70] sm:$0xff] }
  0x9a   : > { %2193 = vmatpush1.bf16.msra.mxu0 %v2192_v52  ;;  %v2212_v52 = vpack.c.bf16 %v711_v46, %v703_v45  ;;  %v2242_v37 = vpack.c.bf16 %v840_v35, %v832_v34  ;;  %v847_v45 = vld [vmem:[%s4353_s3 + $0x790] sm:$0xff]  ;;  %v658_v35 = vld [vmem:[%s4353_s3 + $0x1a8] sm:$0xff] }
  0x9b   : > { %2195 = vmatprep.subr.bf16.mxu0 %v2194_v56  ;;  %2181 = vmatpush1.bf16.msra.mxu1 %v2180_v39  ;;  %v736_v56 = vld [vmem:[%s4353_s3 + $0x418] sm:$0xff]  ;;  %v839_v39 = vld [vmem:[%s4353_s3 + $0x750] sm:$0xff] }
  0x9c   : > { %2183 = vmatprep.subr.bf16.mxu1 %v2182_v41  ;;  %v2218_v59 = vpack.c.bf16 %v744_v57, %v736_v56  ;;  %v856_v41 = vld [vmem:[%s4353_s3 + $0x7d8] sm:$0xff]  ;;  %v2244_v43 = vpack.c.bf16 %v839_v39, %v831_v38  ;;  %v855_v46 = vld [vmem:[%s4353_s3 + $0x7d0] sm:$0xff]  ;;  %v862_v56 = vld [vmem:[%s4352_s2 + $0x8] sm:$0xff] }
  0x9d   : > { %535 = vmatmul.mubr.bf16.gmra.mrb[4].mxu0 %v2442_v63  ;;  %v760_v63 = vld [vmem:[%s4353_s3 + $0x4d8] sm:$0xff]  ;;  %v2248_v47 = vpack.c.bf16 %v855_v46, %v847_v45  ;;  %884 = vperm.xlu0 %2435, %v862_v56   ;;  %v863_v57 = vld [vmem:[%s4352_s2 + $0x10] sm:$0xff] }
  0x9e   : > { %544 = vmatprep.mubr.bf16.mxu0 %v2443_v0  ;;  %2197 = vmatpush1.bf16.msra.mxu0 %v2196_v2  ;;  %v2451_v0 = vld [vmem:[%s4351_s1 + $0x40] ss:$8 sps:$4 sm:$0xff]   ;;  %v2220_v2 = vpack.c.bf16 %v743_v61, %v735_v60  ;;  %v2222_v3 = vpack.c.bf16 %v760_v63, %v752_v62  ;;  %v867_v61 = vld [vmem:[%s4352_s2 + $0x30] sm:$0xff]  ;;  %v868_v62 = vld [vmem:[%s4352_s2 + $0x38] sm:$0xff] }
  0x9f   : > { %2199 = vmatprep.subr.bf16.mxu0 %v2198_v6  ;;  %2185 = vmatpush1.bf16.msra.mxu1 %v2184_v50  ;;  %v768_v6 = vld [vmem:[%s4353_s3 + $0x518] sm:$0xff]  ;;  %v866_v60 = vld [vmem:[%s4352_s2 + $0x28] sm:$0xff]  ;;  %v869_v63 = vld [vmem:[%s4352_s2 + $0x40] sm:$0xff] }
  0xa0   : > { %v2226_v9 = vpack.c.bf16 %v776_v7, %v768_v6  ;;  %v612_v50 = vld [vmem:[%s4353_s3 + $0x38] sm:$0xff]  ;;  %889 = vperm.xlu1 %2436, %v863_v57   ;;  %v626_v6 = vld [vmem:[%s4353_s3 + $0xa8] sm:$0xff]  ;;  %v635_v21 = vld [vmem:[%s4353_s3 + $0xf0] sm:$0xff] }
  0xa1   : > { %v634_v7 = vld [vmem:[%s4353_s3 + $0xe8] sm:$0xff]  ;;  %v651_v34 = vld [vmem:[%s4353_s3 + $0x170] sm:$0xff]  ;;  %v673_v57 = vld [vmem:[%s4353_s3 + $0x220] sm:$0xff] }
  0xa2   : > { %2201 = vmatpush1.bf16.msra.mxu0 %v2200_v14  ;;  %v2454_v14 = vld [vmem:[%s4351_s1 + $0x50] ss:$8 sps:$4 sm:$0xff]  }
  0xa3   : > { %2203 = vmatprep.subr.bf16.mxu0 %v2202_v18  ;;  %v783_v18 = vld [vmem:[%s4353_s3 + $0x590] sm:$0xff] }
  0xa4   : > { %v2232_v22 = vpack.c.bf16 %v791_v19, %v783_v18  ;;  %v2254_v19 = vpack.c.bf16 %v634_v7, %v626_v6  ;;  %v689_v7 = vld [vmem:[%s4353_s3 + $0x2a0] sm:$0xff] }
  0xa5   : > { %545 = vmatmul.mubr.bf16.gmra.mrb[8].mxu0 %v2445_v25  ;;  %v807_v25 = vld [vmem:[%s4353_s3 + $0x650] sm:$0xff] }
  0xa6   : > { %554 = vmatprep.mubr.bf16.mxu0 %v2446_v26  ;;  %2205 = vmatpush1.bf16.msra.mxu0 %v2204_v28  ;;  %v816_v26 = vld [vmem:[%s4353_s3 + $0x698] sm:$0xff]  ;;  %v2457_v28 = vld [vmem:[%s4351_s1 + $0x60] ss:$8 sps:$4 sm:$0xff]   ;;  %v2236_v30 = vpack.c.bf16 %v807_v25, %v799_v24 }
  0xa7   : > { %2207 = vmatprep.subr.bf16.mxu0 %v2206_v32  ;;  %v2238_v31 = vpack.c.bf16 %v824_v27, %v816_v26  ;;  %v815_v32 = vld [vmem:[%s4353_s3 + $0x690] sm:$0xff]  ;;  %v641_v26 = vld [vmem:[%s4353_s3 + $0x120] sm:$0xff]  ;;  %v644_v27 = vld [vmem:[%s4353_s3 + $0x138] sm:$0xff] }
  0xa8   : > { %v2240_v36 = vpack.c.bf16 %v823_v33, %v815_v32  ;;  %v873_v32 = vld [vmem:[%s4352_s2 + $0x60] sm:$0xff]  ;;  %v643_v33 = vld [vmem:[%s4353_s3 + $0x130] sm:$0xff] }
  0xa9   : > { %v3468_v46 = vpack.c.bf16 %v651_v34, %v643_v33  ;;  %v716_v33 = vld [vmem:[%s4353_s3 + $0x378] sm:$0xff]  ;;  %v707_v34 = vld [vmem:[%s4353_s3 + $0x330] sm:$0xff] }
  0xaa   : > { %2209 = vmatpush1.bf16.msra.mxu0 %v2208_v40  ;;  %v848_v40 = vld [vmem:[%s4353_s3 + $0x798] sm:$0xff] }
  0xab   : > { %2211 = vmatprep.subr.bf16.mxu0 %v2210_v44  ;;  %v2246_v44 = vpack.c.bf16 %v856_v41, %v848_v40  ;;  %v660_v40 = vld [vmem:[%s4353_s3 + $0x1b8] sm:$0xff] }
  0xad   : > { %555 = vmatmul.mubr.bf16.gmra.mrb[12].mxu0 %v2448_v49  ;;  %v618_v49 = vld [vmem:[%s4353_s3 + $0x68] sm:$0xff] }
  0xae   : > { %564 = vmatprep.mubr.bf16.mxu0 %v2449_v51  ;;  %2213 = vmatpush1.bf16.msra.mxu0 %v2212_v52  ;;  %v2250_v51 = vpack.c.bf16 %v618_v49, %v610_v48  ;;  %v620_v52 = vld [vmem:[%s4353_s3 + $0x78] sm:$0xff]  ;;  %v674_v48 = vld [vmem:[%s4353_s3 + $0x228] sm:$0xff] }
  0xaf   : > { %2215 = vmatprep.subr.bf16.mxu0 %v2214_v53  ;;  %v3313_v53 = vpack.c.bf16 %v620_v52, %v612_v50  ;;  %v682_v49 = vld [vmem:[%s4353_s3 + $0x268] sm:$0xff]  ;;  %v667_v52 = vld [vmem:[%s4353_s3 + $0x1f0] sm:$0xff] }
  0xb0   : > { %2251 = vmatprep.subr.bf16.mxu1 %v2250_v51  ;;  %v659_v51 = vld [vmem:[%s4353_s3 + $0x1b0] sm:$0xff]  ;;  %v2266_v56 = vpack.c.bf16 %v682_v49, %v674_v48  ;;  %v729_v48 = vld [vmem:[%s4353_s3 + $0x3e0] sm:$0xff]  ;;  %v724_v49 = vld [vmem:[%s4353_s3 + $0x3b8] sm:$0xff] }
  0xb2   : > { %2217 = vmatpush1.bf16.msra.mxu0 %v2216_v58  ;;  %v864_v58 = vld [vmem:[%s4352_s2 + $0x18] sm:$0xff] }
  0xb3   : > { %2219 = vmatprep.subr.bf16.mxu0 %v2218_v59  ;;  %894 = vperm.xlu1 %2436, %v864_v58   ;;  %v865_v59 = vld [vmem:[%s4352_s2 + $0x20] sm:$0xff] }
  0xb4   : > { %899 = vperm.xlu0 %2435, %v865_v59   ;;  %v681_v58 = vld [vmem:[%s4353_s3 + $0x260] sm:$0xff]  ;;  %v3498_v59 = vpack.c.bf16 %v667_v52, %v659_v51 }
  0xb5   : > { %565 = vmatmul.mubr.bf16.gmra.mrb[16].mxu0 %v2451_v0  ;;  %v870_v0 = vld [vmem:[%s4352_s2 + $0x48] sm:$0xff] }
  0xb6   : > { %574 = vmatprep.mubr.bf16.mxu0 %v2452_v1  ;;  %2221 = vmatpush1.bf16.msra.mxu0 %v2220_v2  ;;  %v609_v1 = vld [vmem:[%s4353_s3 + $0x20] sm:$0xff] }
  0xb7   : > { %2223 = vmatprep.subr.bf16.mxu0 %v2222_v3  ;;  %904 = vperm.xlu1 %2436, %v866_v60   ;;  %v617_v2 = vld [vmem:[%s4353_s3 + $0x60] sm:$0xff]  ;;  %v871_v3 = vld [vmem:[%s4352_s2 + $0x50] sm:$0xff]  ;;  %v676_v60 = vld [vmem:[%s4353_s3 + $0x238] sm:$0xff] }
  0xb8   : > { %909 = vperm.xlu0 %2435, %v867_v61   ;;  %v2252_v11 = vpack.c.bf16 %v617_v2, %v609_v1  ;;  %v684_v61 = vld [vmem:[%s4353_s3 + $0x278] sm:$0xff]  ;;  %v2268_v2 = vpack.c.bf16 %v681_v58, %v673_v57  ;;  %v746_v57 = vld [vmem:[%s4353_s3 + $0x468] sm:$0xff] }
  0xb9   : > { %v3528_v6 = vpack.c.bf16 %v684_v61, %v676_v60  ;;  %v723_v61 = vld [vmem:[%s4353_s3 + $0x3b0] sm:$0xff] }
  0xba   : > { %2225 = vmatpush1.bf16.msra.mxu0 %v2224_v8  ;;  %v628_v8 = vld [vmem:[%s4353_s3 + $0xb8] sm:$0xff] }
  0xbb   : > { %2227 = vmatprep.subr.bf16.mxu0 %v2226_v9  ;;  %914 = vperm.xlu1 %2436, %v868_v62   ;;  %v636_v9 = vld [vmem:[%s4353_s3 + $0xf8] sm:$0xff]  ;;  %v874_v62 = vld [vmem:[%s4352_s2 + $0x68] sm:$0xff] }
  0xbc   : > { %919 = vperm.xlu0 %2435, %v869_v63   ;;  %v3395_v20 = vpack.c.bf16 %v636_v9, %v628_v8  ;;  %v675_v63 = vld [vmem:[%s4353_s3 + $0x230] sm:$0xff]  ;;  %v697_v8 = vld [vmem:[%s4353_s3 + $0x2e0] sm:$0xff]  ;;  %v692_v9 = vld [vmem:[%s4353_s3 + $0x2b8] sm:$0xff] }
  0xbd   : > { %575 = vmatmul.mubr.bf16.gmra.mrb[20].mxu0 %v2454_v14  ;;  %v3380_v14 = vpack.c.bf16 %v619_v5, %v611_v4  ;;  %v698_v4 = vld [vmem:[%s4353_s3 + $0x2e8] sm:$0xff] }
  0xbe   : > { %584 = vmatprep.mubr.bf16.mxu0 %v2455_v15  ;;  %2229 = vmatpush1.bf16.msra.mxu0 %v2228_v16  ;;  %v625_v15 = vld [vmem:[%s4353_s3 + $0xa0] sm:$0xff] }
  0xbf   : > { %2231 = vmatprep.subr.bf16.mxu0 %v2230_v17  ;;  %924 = vperm.xlu1 %2436, %v870_v0   ;;  %v633_v16 = vld [vmem:[%s4353_s3 + $0xe0] sm:$0xff]  ;;  %v627_v17 = vld [vmem:[%s4353_s3 + $0xb0] sm:$0xff] }
  0xc0   : > { %929 = vperm.xlu0 %2435, %v871_v3   ;;  %v2256_v25 = vpack.c.bf16 %v633_v16, %v625_v15  ;;  %v683_v0 = vld [vmem:[%s4353_s3 + $0x270] sm:$0xff]  ;;  %v690_v3 = vld [vmem:[%s4353_s3 + $0x2a8] sm:$0xff]  ;;  %v700_v15 = vld [vmem:[%s4353_s3 + $0x2f8] sm:$0xff] }
  0xc1   : > { %v706_v16 = vld [vmem:[%s4353_s3 + $0x328] sm:$0xff] }
  0xc2   : > { %2233 = vmatpush1.bf16.msra.mxu0 %v2232_v22  ;;  %v642_v22 = vld [vmem:[%s4353_s3 + $0x128] sm:$0xff] }
  0xc3   : > { %2235 = vmatprep.subr.bf16.mxu0 %v2234_v23  ;;  %934 = vperm.xlu1 %2436, %v872_v12   ;;  %v650_v23 = vld [vmem:[%s4353_s3 + $0x168] sm:$0xff]  ;;  %v3543_v12 = vpack.c.bf16 %v683_v0, %v675_v63 }
  0xc4   : > { %939 = vperm.xlu0 %2435, %v873_v32   ;;  %v708_v32 = vld [vmem:[%s4353_s3 + $0x338] sm:$0xff] }
  0xc5   : > { %585 = vmatmul.mubr.bf16.gmra.mrb[24].mxu0 %v2457_v28  ;;  %v3419_v28 = vpack.c.bf16 %v635_v21, %v627_v17  ;;  %v714_v17 = vld [vmem:[%s4353_s3 + $0x368] sm:$0xff]  ;;  %v2270_v21 = vpack.c.bf16 %v698_v4, %v690_v3  ;;  %v737_v3 = vld [vmem:[%s4353_s3 + $0x420] sm:$0xff] }
  0xc6   : > { %594 = vmatprep.mubr.bf16.mxu0 %v2458_v29  ;;  %2237 = vmatpush1.bf16.msra.mxu0 %v2236_v30  ;;  %v2258_v29 = vpack.c.bf16 %v650_v23, %v642_v22  ;;  %v649_v30 = vld [vmem:[%s4353_s3 + $0x160] sm:$0xff]  ;;  %v691_v22 = vld [vmem:[%s4353_s3 + $0x2b0] sm:$0xff] }
  0xc7   : > { %2239 = vmatprep.subr.bf16.mxu0 %v2238_v31  ;;  %v652_v31 = vld [vmem:[%s4353_s3 + $0x178] sm:$0xff]  ;;  %v2260_v38 = vpack.c.bf16 %v649_v30, %v641_v26  ;;  %944 = vperm.xlu1 %2436, %v874_v62   ;;  %v699_v23 = vld [vmem:[%s4353_s3 + $0x2f0] sm:$0xff]  ;;  %v3567_v26 = vpack.c.bf16 %v700_v15, %v692_v9  ;;  %v713_v30 = vld [vmem:[%s4353_s3 + $0x360] sm:$0xff] }
  0xc8   : > { %v3447_v39 = vpack.c.bf16 %v652_v31, %v644_v27  ;;  %v2274_v27 = vpack.c.bf16 %v714_v17, %v706_v16  ;;  %v3577_v31 = vpack.c.bf16 %v699_v23, %v691_v22  ;;  %v731_v62 = vld [vmem:[%s4353_s3 + $0x3f0] sm:$0xff]  ;;  %v745_v4 = vld [vmem:[%s4353_s3 + $0x460] sm:$0xff]  ;;  %v748_v9 = vld [vmem:[%s4353_s3 + $0x478] sm:$0xff] }
  0xc9   : > { %v739_v15 = vld [vmem:[%s4353_s3 + $0x430] sm:$0xff]  ;;  %v754_v22 = vld [vmem:[%s4353_s3 + $0x4a8] sm:$0xff] }
  0xca   : > { %2241 = vmatpush1.bf16.msra.mxu0 %v2240_v36  ;;  %v666_v36 = vld [vmem:[%s4353_s3 + $0x1e8] sm:$0xff]  ;;  %v747_v16 = vld [vmem:[%s4353_s3 + $0x470] sm:$0xff] }
  0xcb   : > { %2243 = vmatprep.subr.bf16.mxu0 %v2242_v37  ;;  %v762_v23 = vld [vmem:[%s4353_s3 + $0x4e8] sm:$0xff] }
  0xcd   : > { %595 = vmatmul.mubr.bf16.gmra.mrb[28].mxu0 %v2460_v42  ;;  %v657_v42 = vld [vmem:[%s4353_s3 + $0x1a0] sm:$0xff] }
  0xce   : > { %2245 = vmatpush1.bf16.msra.mxu0 %v2244_v43  ;;  %v665_v43 = vld [vmem:[%s4353_s3 + $0x1e0] sm:$0xff] }
  0xcf   : > { %2247 = vmatprep.subr.bf16.mxu0 %v2246_v44  ;;  %v668_v44 = vld [vmem:[%s4353_s3 + $0x1f8] sm:$0xff]  ;;  %v2264_v54 = vpack.c.bf16 %v665_v43, %v657_v42  ;;  %v730_v42 = vld [vmem:[%s4353_s3 + $0x3e8] sm:$0xff] }
  0xd0   : > { %v3487_v55 = vpack.c.bf16 %v668_v44, %v660_v40  ;;  %v722_v40 = vld [vmem:[%s4353_s3 + $0x3a8] sm:$0xff]  ;;  %v3604_v44 = vpack.c.bf16 %v716_v33, %v708_v32  ;;  %v756_v32 = vld [vmem:[%s4353_s3 + $0x4b8] sm:$0xff] }
  0xd1   : > { %v2278_v60 = vpack.c.bf16 %v730_v42, %v722_v40  ;;  %v778_v40 = vld [vmem:[%s4353_s3 + $0x568] sm:$0xff] }
  0xd2   : > { %2249 = vmatpush1.bf16.msra.mxu0 %v2248_v47  ;;  %v2262_v47 = vpack.c.bf16 %v666_v36, %v658_v35  ;;  %v715_v35 = vld [vmem:[%s4353_s3 + $0x370] sm:$0xff] }
  0xd3   : > { %2315 = vmatprep.subr.bf16.mxu0 %v3313_v53  ;;  %v3619_v52 = vpack.c.bf16 %v715_v35, %v707_v34  ;;  %v3695_v34 = vpack.c.bf16 %v747_v16, %v739_v15  ;;  %v764_v35 = vld [vmem:[%s4353_s3 + $0x4f8] sm:$0xff]  ;;  %v786_v15 = vld [vmem:[%s4353_s3 + $0x5a8] sm:$0xff] }
  0xd4   : > { %v794_v16 = vld [vmem:[%s4353_s3 + $0x5e8] sm:$0xff] }
 0x168   : > { %v3373_v10 = vpop.f32.mrb[0].mxu0 }
 0x169   : > { %v3378_v13 = vpop.f32.mrb[1].mxu0 }
 0x16a   : > { %v3391_v18 = vpop.f32.mrb[2].mxu0  ;;  %1021 = vmatprep.mubr.f32.mxu1 %v3378_v13  ;;  %1182 = vmatprep.mubr.f32.mxu0 %v3378_v13 }
 0x16b   : > { %v3406_v24 = vpop.f32.mrb[3].mxu0  ;;  %1022 = vmatmul.mubr.f32.vlgmr.msra.gmra.mrb[0].mxu1 %v3373_v10  ;;  %1183 = vmatmul.mubr.f32.vlgmr.msra.gmra.mrb[32].mxu0 %v3373_v10 }
 0x16c   : > { %2253 = vmatpush1.bf16.msra.mxu1 %v2252_v11  ;;  %1027 = vmatprep.mubr.f32.mxu1 %v3406_v24 }
 0x16d   : > { %1188 = vmatprep.mubr.f32.mxu0 %v3406_v24  ;;  %2317 = vmatpush1.bf16.msra.mxu0 %v3380_v14 }
 0x16e   : > { %2255 = vmatprep.subr.bf16.mxu1 %v2254_v19  ;;  %2319 = vmatprep.subr.bf16.mxu0 %v3395_v20 }
 0x16f   : > { %1028 = vmatmul.mubr.f32.gmra.mrb[2].mxu1 %v3391_v18  ;;  %1189 = vmatmul.mubr.f32.gmra.mrb[34].mxu0 %v3391_v18 }
 0x170   : > { %2257 = vmatpush1.bf16.msra.mxu1 %v2256_v25  ;;  %v3445_v37 = vpop.f32.mrb[4].mxu0  ;;  %v2272_v25 = vpack.c.bf16 %v697_v8, %v689_v7  ;;  %v3653_v7 = vpack.c.bf16 %v731_v62, %v723_v61  ;;  %v740_v8 = vld [vmem:[%s4353_s3 + $0x438] sm:$0xff]  ;;  %v777_v61 = vld [vmem:[%s4353_s3 + $0x560] sm:$0xff] }
 0x171   : > { %2321 = vmatpush1.bf16.msra.mxu0 %v3419_v28  ;;  %v3453_v41 = vpop.f32.mrb[5].mxu0  ;;  %2259 = vmatprep.subr.bf16.mxu1 %v2258_v29  ;;  %v705_v29 = vld [vmem:[%s4353_s3 + $0x320] sm:$0xff] }
 0x172   : > { %v3464_v45 = vpop.f32.mrb[6].mxu0  ;;  %1033 = vmatprep.mubr.f32.mxu1 %v3453_v41  ;;  %1194 = vmatprep.mubr.f32.mxu0 %v3453_v41 }
 0x173   : > { %v3476_v50 = vpop.f32.mrb[7].mxu0  ;;  %1034 = vmatmul.mubr.f32.gmra.mrb[4].mxu1 %v3445_v37  ;;  %1195 = vmatmul.mubr.f32.gmra.mrb[36].mxu0 %v3445_v37 }
 0x174   : > { %2261 = vmatpush1.bf16.msra.mxu1 %v2260_v38  ;;  %2323 = vmatprep.subr.bf16.mxu0 %v3447_v39  ;;  %v2276_v38 = vpack.c.bf16 %v713_v30, %v705_v29  ;;  %v753_v29 = vld [vmem:[%s4353_s3 + $0x4a0] sm:$0xff] }
 0x175   : > { %1039 = vmatprep.mubr.f32.mxu1 %v3476_v50  ;;  %1200 = vmatprep.mubr.f32.mxu0 %v3476_v50  ;;  %v761_v30 = vld [vmem:[%s4353_s3 + $0x4e0] sm:$0xff] }
 0x176   : > { %2325 = vmatpush1.bf16.msra.mxu0 %v3468_v46  ;;  %2263 = vmatprep.subr.bf16.mxu1 %v2262_v47  ;;  %v721_v47 = vld [vmem:[%s4353_s3 + $0x3a0] sm:$0xff] }
 0x177   : > { %1040 = vmatmul.mubr.f32.gmra.mrb[6].mxu1 %v3464_v45  ;;  %1201 = vmatmul.mubr.f32.gmra.mrb[38].mxu0 %v3464_v45  ;;  %v2280_v63 = vpack.c.bf16 %v729_v48, %v721_v47  ;;  %v2286_v47 = vpack.c.bf16 %v762_v23, %v754_v22  ;;  %v755_v48 = vld [vmem:[%s4353_s3 + $0x4b0] sm:$0xff]  ;;  %v785_v23 = vld [vmem:[%s4353_s3 + $0x5a0] sm:$0xff] }
 0x178   : > { %2265 = vmatpush1.bf16.msra.mxu1 %v2264_v54  ;;  %2327 = vmatprep.subr.bf16.mxu0 %v3487_v55  ;;  %v3518_v1 = vpop.f32.mrb[8].mxu0  ;;  %v732_v54 = vld [vmem:[%s4353_s3 + $0x3f8] sm:$0xff] }
 0x179   : > { %v3526_v5 = vpop.f32.mrb[9].mxu0  ;;  %2267 = vmatprep.subr.bf16.mxu1 %v2266_v56  ;;  %v738_v56 = vld [vmem:[%s4353_s3 + $0x428] sm:$0xff]  ;;  %v3643_v0 = vpack.c.bf16 %v732_v54, %v724_v49  ;;  %v763_v49 = vld [vmem:[%s4353_s3 + $0x4f0] sm:$0xff]  ;;  %v2288_v54 = vpack.c.bf16 %v761_v30, %v753_v29  ;;  %v793_v29 = vld [vmem:[%s4353_s3 + $0x5e0] sm:$0xff] }
 0x17a   : > { %2329 = vmatpush1.bf16.msra.mxu0 %v3498_v59  ;;  %v3540_v11 = vpop.f32.mrb[10].mxu0  ;;  %1045 = vmatprep.mubr.f32.mxu1 %v3526_v5  ;;  %v3729_v62 = vpack.c.bf16 %v763_v49, %v755_v48  ;;  %v788_v30 = vld [vmem:[%s4353_s3 + $0x5b8] sm:$0xff]  ;;  %v2294_v49 = vpack.c.bf16 %v794_v16, %v786_v15  ;;  %v803_v16 = vld [vmem:[%s4353_s3 + $0x630] sm:$0xff] }
 0x17b   : > { %1206 = vmatprep.mubr.f32.mxu0 %v3526_v5  ;;  %v3555_v19 = vpop.f32.mrb[11].mxu0  ;;  %1046 = vmatmul.mubr.f32.gmra.mrb[8].mxu1 %v3518_v1  ;;  %v812_v15 = vld [vmem:[%s4353_s3 + $0x678] sm:$0xff] }
 0x17c   : > { %1207 = vmatmul.mubr.f32.gmra.mrb[40].mxu0 %v3518_v1  ;;  %2269 = vmatpush1.bf16.msra.mxu1 %v2268_v2  ;;  %v2282_v2 = vpack.c.bf16 %v746_v57, %v738_v56  ;;  %v3719_v56 = vpack.c.bf16 %v764_v35, %v756_v32 }
 0x17d   : > { %2331 = vmatprep.subr.bf16.mxu0 %v3528_v6  ;;  %1051 = vmatprep.mubr.f32.mxu1 %v3555_v19 }
 0x17e   : > { %1212 = vmatprep.mubr.f32.mxu0 %v3555_v19  ;;  %2333 = vmatpush1.bf16.msra.mxu0 %v3543_v12 }
 0x17f   : > { %2271 = vmatprep.subr.bf16.mxu1 %v2270_v21  ;;  %1052 = vmatmul.mubr.f32.gmra.mrb[10].mxu1 %v3540_v11  ;;  %v2284_v21 = vpack.c.bf16 %v745_v4, %v737_v3  ;;  %v771_v3 = vld [vmem:[%s4353_s3 + $0x530] sm:$0xff] }
 0x180   : > { %1213 = vmatmul.mubr.f32.gmra.mrb[42].mxu0 %v3540_v11  ;;  %2273 = vmatpush1.bf16.msra.mxu1 %v2272_v25  ;;  %v3593_v36 = vpop.f32.mrb[12].mxu0  ;;  %v779_v4 = vld [vmem:[%s4353_s3 + $0x570] sm:$0xff] }
 0x181   : > { %2335 = vmatprep.subr.bf16.mxu0 %v3567_v26  ;;  %v3602_v43 = vpop.f32.mrb[13].mxu0  ;;  %2275 = vmatprep.subr.bf16.mxu1 %v2274_v27  ;;  %v3680_v27 = vpack.c.bf16 %v748_v9, %v740_v8  ;;  %v3771_v35 = vpack.c.bf16 %v779_v4, %v771_v3  ;;  %v809_v3 = vld [vmem:[%s4353_s3 + $0x660] sm:$0xff] }
 0x182   : > { %2337 = vmatpush1.bf16.msra.mxu0 %v3577_v31  ;;  %v3616_v51 = vpop.f32.mrb[14].mxu0  ;;  %1057 = vmatprep.mubr.f32.mxu1 %v3602_v43 }
 0x183   : > { %1218 = vmatprep.mubr.f32.mxu0 %v3602_v43  ;;  %v3631_v58 = vpop.f32.mrb[15].mxu0  ;;  %1058 = vmatmul.mubr.f32.gmra.mrb[12].mxu1 %v3593_v36 }
 0x184   : > { %1219 = vmatmul.mubr.f32.gmra.mrb[44].mxu0 %v3593_v36  ;;  %2277 = vmatpush1.bf16.msra.mxu1 %v2276_v38  ;;  %v770_v38 = vld [vmem:[%s4353_s3 + $0x528] sm:$0xff] }
 0x185   : > { %2339 = vmatprep.subr.bf16.mxu0 %v3604_v44  ;;  %1063 = vmatprep.mubr.f32.mxu1 %v3631_v58  ;;  %v2290_v57 = vpack.c.bf16 %v778_v40, %v770_v38  ;;  %v796_v38 = vld [vmem:[%s4353_s3 + $0x5f8] sm:$0xff]  ;;  %v802_v40 = vld [vmem:[%s4353_s3 + $0x628] sm:$0xff] }
 0x186   : > { %1224 = vmatprep.mubr.f32.mxu0 %v3631_v58  ;;  %2341 = vmatpush1.bf16.msra.mxu0 %v3619_v52 }
 0x187   : > { %2279 = vmatprep.subr.bf16.mxu1 %v2278_v60  ;;  %1064 = vmatmul.mubr.f32.gmra.mrb[14].mxu1 %v3616_v51  ;;  %v769_v60 = vld [vmem:[%s4353_s3 + $0x520] sm:$0xff] }
 0x188   : > { %1225 = vmatmul.mubr.f32.gmra.mrb[46].mxu0 %v3616_v51  ;;  %2281 = vmatpush1.bf16.msra.mxu1 %v2280_v63  ;;  %v3669_v17 = vpop.f32.mrb[16].mxu0  ;;  %v772_v63 = vld [vmem:[%s4353_s3 + $0x538] sm:$0xff]  ;;  %v2292_v9 = vpack.c.bf16 %v777_v61, %v769_v60  ;;  %v2296_v60 = vpack.c.bf16 %v793_v29, %v785_v23  ;;  %v3795_v61 = vpack.c.bf16 %v796_v38, %v788_v30  ;;  %v811_v23 = vld [vmem:[%s4353_s3 + $0x670] sm:$0xff]  ;;  %v818_v38 = vld [vmem:[%s4353_s3 + $0x6a8] sm:$0xff] }
 0x189   : > { %2343 = vmatprep.subr.bf16.mxu0 %v3643_v0  ;;  %v3678_v25 = vpop.f32.mrb[17].mxu0  ;;  %2283 = vmatprep.subr.bf16.mxu1 %v2282_v2  ;;  %v780_v2 = vld [vmem:[%s4353_s3 + $0x578] sm:$0xff] }
 0x18a   : > { %2345 = vmatpush1.bf16.msra.mxu0 %v3653_v7  ;;  %v3692_v33 = vpop.f32.mrb[18].mxu0  ;;  %1069 = vmatprep.mubr.f32.mxu1 %v3678_v25  ;;  %v3756_v22 = vpack.c.bf16 %v780_v2, %v772_v63  ;;  %4374 = vst [vmem:[#allocation4_spill] sm:$0xff] %v3795_v61  ;;  %v801_v2 = vld [vmem:[%s4353_s3 + $0x620] sm:$0xff] }
 0x18b   : > { %1230 = vmatprep.mubr.f32.mxu0 %v3678_v25  ;;  %v3707_v42 = vpop.f32.mrb[19].mxu0  ;;  %1070 = vmatmul.mubr.f32.gmra.mrb[16].mxu1 %v3669_v17  ;;  %v2300_v30 = vpack.c.bf16 %v809_v3, %v801_v2  ;;  %v828_v3 = vld [vmem:[%s4353_s3 + $0x6f8] sm:$0xff] }
 0x18c   : > { %1231 = vmatmul.mubr.f32.gmra.mrb[48].mxu0 %v3669_v17  ;;  %2285 = vmatpush1.bf16.msra.mxu1 %v2284_v21 }
 0x18d   : > { %2347 = vmatprep.subr.bf16.mxu0 %v3680_v27  ;;  %1075 = vmatprep.mubr.f32.mxu1 %v3707_v42 }
 0x18e   : > { %1236 = vmatprep.mubr.f32.mxu0 %v3707_v42  ;;  %2349 = vmatpush1.bf16.msra.mxu0 %v3695_v34 }
 0x18f   : > { %2287 = vmatprep.subr.bf16.mxu1 %v2286_v47  ;;  %1076 = vmatmul.mubr.f32.gmra.mrb[18].mxu1 %v3692_v33  ;;  %v810_v47 = vld [vmem:[%s4353_s3 + $0x668] sm:$0xff] }
 0x190   : > { %1237 = vmatmul.mubr.f32.gmra.mrb[50].mxu0 %v3692_v33  ;;  %2289 = vmatpush1.bf16.msra.mxu1 %v2288_v54  ;;  %v3745_v8 = vpop.f32.mrb[20].mxu0  ;;  %v787_v54 = vld [vmem:[%s4353_s3 + $0x5b0] sm:$0xff]  ;;  %v2298_v63 = vpack.c.bf16 %v810_v47, %v802_v40  ;;  %v826_v40 = vld [vmem:[%s4353_s3 + $0x6e8] sm:$0xff] }
 0x191   : > { %2351 = vmatprep.subr.bf16.mxu0 %v3719_v56  ;;  %v3754_v21 = vpop.f32.mrb[21].mxu0  ;;  %2291 = vmatprep.subr.bf16.mxu1 %v2290_v57  ;;  %v795_v57 = vld [vmem:[%s4353_s3 + $0x5f0] sm:$0xff] }
 0x192   : > { %2353 = vmatpush1.bf16.msra.mxu0 %v3729_v62  ;;  %v3768_v32 = vpop.f32.mrb[22].mxu0  ;;  %1081 = vmatprep.mubr.f32.mxu1 %v3754_v21  ;;  %v3805_v4 = vpack.c.bf16 %v795_v57, %v787_v54  ;;  %v817_v54 = vld [vmem:[%s4353_s3 + $0x6a0] sm:$0xff] }
 0x193   : > { %4372 = vst [vmem:[#allocation2_spill] sm:$0xff] %v3768_v32  ;;  %1242 = vmatprep.mubr.f32.mxu0 %v3754_v21  ;;  %v3783_v48 = vpop.f32.mrb[23].mxu0  ;;  %1082 = vmatmul.mubr.f32.gmra.mrb[20].mxu1 %v3745_v8  ;;  %v825_v57 = vld [vmem:[%s4353_s3 + $0x6e0] sm:$0xff] }
 0x194   : > { %4373 = vst [vmem:[#allocation3_spill] sm:$0xff] %v3783_v48  ;;  %1243 = vmatmul.mubr.f32.gmra.mrb[52].mxu0 %v3745_v8  ;;  %2293 = vmatpush1.bf16.msra.mxu1 %v2292_v9  ;;  %4375 = vst [vmem:[#allocation5_spill] sm:$0xff] %v3805_v4  ;;  %v804_v9 = vld [vmem:[%s4353_s3 + $0x638] sm:$0xff] }
 0x195   : > { %2355 = vmatprep.subr.bf16.mxu0 %v3756_v22  ;;  %1087 = vmatprep.mubr.f32.mxu1 %v3783_v48 }
 0x196   : > { %1248 = vmatprep.mubr.f32.mxu0 %v3783_v48  ;;  %2357 = vmatpush1.bf16.msra.mxu0 %v3771_v35 }
 0x197   : > { %2295 = vmatprep.subr.bf16.mxu1 %v2294_v49  ;;  %1088 = vmatmul.mubr.f32.gmra.mrb[22].mxu1 %v3768_v32  ;;  %v3832_v49 = vpack.c.bf16 %v812_v15, %v804_v9  ;;  %v834_v9 = vld [vmem:[%s4353_s3 + $0x728] sm:$0xff] }
 0x198   : > { %1249 = vmatmul.mubr.f32.gmra.mrb[54].mxu0 %v3768_v32  ;;  %2297 = vmatpush1.bf16.msra.mxu1 %v2296_v60  ;;  %v3821_v29 = vpop.f32.mrb[24].mxu0  ;;  %v820_v60 = vld [vmem:[%s4353_s3 + $0x6b8] sm:$0xff]  ;;  %v842_v15 = vld [vmem:[%s4353_s3 + $0x768] sm:$0xff]  ;;  %v827_v32 = vld [vmem:[%s4353_s3 + $0x6f0] sm:$0xff] }
 0x199   : > { %2359 = vmatprep.subr.bf16.mxu0 %v3795_v61  ;;  %v3830_v47 = vpop.f32.mrb[25].mxu0  ;;  %2299 = vmatprep.subr.bf16.mxu1 %v2298_v63  ;;  %v3847_v63 = vpack.c.bf16 %v811_v23, %v803_v16  ;;  %v2302_v16 = vpack.c.bf16 %v826_v40, %v818_v38  ;;  %v819_v23 = vld [vmem:[%s4353_s3 + $0x6b0] sm:$0xff]  ;;  %v2304_v61 = vpack.c.bf16 %v825_v57, %v817_v54  ;;  %v833_v38 = vld [vmem:[%s4353_s3 + $0x720] sm:$0xff]  ;;  %v836_v54 = vld [vmem:[%s4353_s3 + $0x738] sm:$0xff] }
 0x19a   : > { %4376 = vst [vmem:[#allocation6_spill] sm:$0xff] %v3830_v47  ;;  %2361 = vmatpush1.bf16.msra.mxu0 %v3805_v4  ;;  %v3844_v2 = vpop.f32.mrb[26].mxu0  ;;  %1093 = vmatprep.mubr.f32.mxu1 %v3830_v47  ;;  %v2306_v48 = vpack.c.bf16 %v842_v15, %v834_v9  ;;  %v841_v40 = vld [vmem:[%s4353_s3 + $0x760] sm:$0xff]  ;;  %v844_v57 = vld [vmem:[%s4353_s3 + $0x778] sm:$0xff]  ;;  %v850_v15 = vld [vmem:[%s4353_s3 + $0x7a8] sm:$0xff] }
 0x19b   : > { %4377 = vst [vmem:[#allocation7_spill] sm:$0xff] %v3844_v2  ;;  %1254 = vmatprep.mubr.f32.mxu0 %v3830_v47  ;;  %v3859_v4 = vpop.f32.mrb[27].mxu0  ;;  %1094 = vmatmul.mubr.f32.gmra.mrb[24].mxu1 %v3821_v29  ;;  %v3871_v47 = vpack.c.bf16 %v828_v3, %v820_v60  ;;  %v835_v60 = vld [vmem:[%s4353_s3 + $0x730] sm:$0xff]  ;;  %v2308_v9 = vpack.c.bf16 %v841_v40, %v833_v38  ;;  %v857_v38 = vld [vmem:[%s4353_s3 + $0x7e0] sm:$0xff] }
 0x19c   : > { %4378 = vst [vmem:[#allocation8_spill] sm:$0xff] %v3859_v4  ;;  %1255 = vmatmul.mubr.f32.gmra.mrb[56].mxu0 %v3821_v29  ;;  %2301 = vmatpush1.bf16.msra.mxu1 %v2300_v30  ;;  %v3881_v30 = vpack.c.bf16 %v827_v32, %v819_v23  ;;  %v843_v32 = vld [vmem:[%s4353_s3 + $0x770] sm:$0xff] }
 0x19d   : > { %2363 = vmatprep.subr.bf16.mxu0 %v3832_v49  ;;  %1099 = vmatprep.mubr.f32.mxu1 %v3859_v4  ;;  %4379 = vst [vmem:[#allocation9_spill] sm:$0xff] %v3871_v47 }
 0x19e   : > { %1260 = vmatprep.mubr.f32.mxu0 %v3859_v4  ;;  %2365 = vmatpush1.bf16.msra.mxu0 %v3847_v63  ;;  %4380 = vst [vmem:[#allocation10_spill] sm:$0xff] %v3881_v30  ;;  %v3908_v4 = vpack.c.bf16 %v844_v57, %v836_v54  ;;  %v860_v54 = vld [vmem:[%s4353_s3 + $0x7f8] sm:$0xff] }
 0x19f   : > { %2303 = vmatprep.subr.bf16.mxu1 %v2302_v16  ;;  %1100 = vmatmul.mubr.f32.gmra.mrb[26].mxu1 %v3844_v2  ;;  %v858_v16 = vld [vmem:[%s4353_s3 + $0x7e8] sm:$0xff] }
 0x1a0   : > { %1261 = vmatmul.mubr.f32.gmra.mrb[58].mxu0 %v3844_v2  ;;  %2305 = vmatpush1.bf16.msra.mxu1 %v2304_v61  ;;  %v3897_v3 = vpop.f32.mrb[28].mxu0  ;;  %v849_v61 = vld [vmem:[%s4353_s3 + $0x7a0] sm:$0xff]  ;;  %v3920_v2 = vpack.c.bf16 %v843_v32, %v835_v60  ;;  %v851_v60 = vld [vmem:[%s4353_s3 + $0x7b0] sm:$0xff] }
 0x1a1   : > { %2367 = vmatprep.subr.bf16.mxu0 %v3871_v47  ;;  %v3906_v23 = vpop.f32.mrb[29].mxu0  ;;  %2307 = vmatprep.subr.bf16.mxu1 %v2306_v48  ;;  %v852_v48 = vld [vmem:[%s4353_s3 + $0x7b8] sm:$0xff]  ;;  %v859_v32 = vld [vmem:[%s4353_s3 + $0x7f0] sm:$0xff]  ;;  %v2312_v47 = vpack.c.bf16 %v857_v38, %v849_v61 }
 0x1a2   : > { %4381 = vst [vmem:[#allocation11_spill] sm:$0xff] %v3906_v23  ;;  %2369 = vmatpush1.bf16.msra.mxu0 %v3881_v30  ;;  %v3917_v40 = vpop.f32.mrb[30].mxu0  ;;  %1105 = vmatprep.mubr.f32.mxu1 %v3906_v23  ;;  %v2310_v30 = vpack.c.bf16 %v858_v16, %v850_v15  ;;  %v3945_v15 = vpack.c.bf16 %v859_v32, %v851_v60 }
 0x1a3   : > { %1266 = vmatprep.mubr.f32.mxu0 %v3906_v23  ;;  %v3929_v57 = vpop.f32.mrb[31].mxu0  ;;  %1106 = vmatmul.mubr.f32.gmra.mrb[28].mxu1 %v3897_v3  ;;  %v3941_v23 = vpack.c.bf16 %v860_v54, %v852_v48 }
 0x1a4   : > { %1267 = vmatmul.mubr.f32.gmra.mrb[60].mxu0 %v3897_v3  ;;  %2309 = vmatpush1.bf16.msra.mxu1 %v2308_v9 }
 0x1a5   : > { %2371 = vmatprep.subr.bf16.mxu0 %v3908_v4  ;;  %1111 = vmatprep.mubr.f32.mxu1 %v3929_v57 }
 0x1a6   : > { %1272 = vmatprep.mubr.f32.mxu0 %v3929_v57  ;;  %2373 = vmatpush1.bf16.msra.mxu0 %v3920_v2 }
 0x1a7   : > { %2311 = vmatprep.subr.bf16.mxu1 %v2310_v30  ;;  %1112 = vmatmul.mubr.f32.gmra.mrb[30].mxu1 %v3917_v40  ;;  %v875_v30 = vld [vmem:[%s4352_s2 + $0x70] sm:$0xff] }
 0x1a8   : > { %1273 = vmatmul.mubr.f32.gmra.mrb[62].mxu0 %v3917_v40  ;;  %2313 = vmatpush1.bf16.msra.mxu1 %v2312_v47  ;;  %v876_v47 = vld [vmem:[%s4352_s2 + $0x78] sm:$0xff] }
 0x1a9   : > { %2375 = vmatprep.subr.bf16.mxu0 %v3941_v23  ;;  %1343 = vmatprep.mubr.f32.mxu1 %v3378_v13 }
 0x1aa   : > { %2377 = vmatpush1.bf16.msra.mxu0 %v3945_v15  ;;  %1504 = vmatprep.mubr.f32.mxu0 %v3378_v13  ;;  %v4384_v13 = vld [vmem:[#allocation2_spill] sm:$0xff] }
 0x1ab   : > { %2378 = vmatprep.subr.bf16.mxu1 %v3313_v53  ;;  %1344 = vmatmul.mubr.f32.vlgmr.msra.gmra.mrb[32].mxu1 %v3373_v10  ;;  %v4382_v53 = vld [vmem:[#allocation3_spill] sm:$0xff] }
 0x1ac   : > { %2394 = vmatpush1.bf16.msra.mxu1 %v3380_v14  ;;  %1349 = vmatprep.mubr.f32.mxu1 %v3406_v24  ;;  %v4385_v14 = vld [vmem:[#allocation5_spill] sm:$0xff] }
 0x1ad   : > { %1505 = vmatmul.mubr.f32.vlgmr.msra.gmra.mrb[64].mxu0 %v3373_v10  ;;  %2379 = vmatprep.subr.bf16.mxu1 %v3395_v20  ;;  %v4383_v10 = vld [vmem:[#allocation4_spill] sm:$0xff] }
 0x1ae   : > { %1510 = vmatprep.mubr.f32.mxu0 %v3406_v24  ;;  %949 = vperm.xlu0 %2435, %v875_v30   ;;  %v4387_v20 = vld [vmem:[#allocation8_spill] sm:$0xff]  ;;  %v4388_v24 = vld [vmem:[#allocation9_spill] sm:$0xff] }
 0x1af   : > { %1350 = vmatmul.mubr.f32.gmra.mrb[34].mxu1 %v3391_v18  ;;  %954 = vperm.xlu1 %2436, %v876_v47  }
 0x1b0   : > { %2395 = vmatpush1.bf16.msra.mxu1 %v3419_v28  ;;  %1355 = vmatprep.mubr.f32.mxu1 %v3453_v41  ;;  %v4389_v28 = vld [vmem:[#allocation7_spill] sm:$0xff] }
 0x1b1   : > { %1511 = vmatmul.mubr.f32.gmra.mrb[66].mxu0 %v3391_v18  ;;  %2380 = vmatprep.subr.bf16.mxu1 %v3447_v39  ;;  %v4386_v18 = vld [vmem:[#allocation6_spill] sm:$0xff]  ;;  %v4391_v39 = vld [vmem:[#allocation11_spill] sm:$0xff] }
 0x1b2   : > { %1516 = vmatprep.mubr.f32.mxu0 %v3453_v41  ;;  %v4053_v41 = vpop.permute.xlu0 %879 }
 0x1b3   : > { %1356 = vmatmul.mubr.f32.gmra.mrb[36].mxu1 %v3445_v37 }
 0x1b4   : > { %2396 = vmatpush1.bf16.msra.mxu1 %v3468_v46  ;;  %1361 = vmatprep.mubr.f32.mxu1 %v3476_v50 }
 0x1b5   : > { %1517 = vmatmul.mubr.f32.gmra.mrb[68].mxu0 %v3445_v37  ;;  %2381 = vmatprep.subr.bf16.mxu1 %v3487_v55  ;;  %v4390_v37 = vld [vmem:[#allocation10_spill] sm:$0xff] }
 0x1b6   : > { %1522 = vmatprep.mubr.f32.mxu0 %v3476_v50 }
 0x1b7   : > { %1362 = vmatmul.mubr.f32.gmra.mrb[38].mxu1 %v3464_v45 }
 0x1b8   : > { %2397 = vmatpush1.bf16.msra.mxu1 %v3498_v59  ;;  %1367 = vmatprep.mubr.f32.mxu1 %v3526_v5 }
 0x1b9   : > { %1523 = vmatmul.mubr.f32.gmra.mrb[70].mxu0 %v3464_v45  ;;  %2382 = vmatprep.subr.bf16.mxu1 %v3528_v6 }
 0x1ba   : > { %1528 = vmatprep.mubr.f32.mxu0 %v3526_v5 }
 0x1bb   : > { %1368 = vmatmul.mubr.f32.gmra.mrb[40].mxu1 %v3518_v1 }
 0x1bc   : > { %2398 = vmatpush1.bf16.msra.mxu1 %v3543_v12  ;;  %1373 = vmatprep.mubr.f32.mxu1 %v3555_v19  ;;  %v4063_v12 = vpop.permute.xlu1 %889 }
 0x1bd   : > { %1529 = vmatmul.mubr.f32.gmra.mrb[72].mxu0 %v3518_v1  ;;  %2383 = vmatprep.subr.bf16.mxu1 %v3567_v26 }
 0x1be   : > { %1534 = vmatprep.mubr.f32.mxu0 %v3555_v19 }
 0x1bf   : > { %1374 = vmatmul.mubr.f32.gmra.mrb[42].mxu1 %v3540_v11 }
 0x1c0   : > { %2399 = vmatpush1.bf16.msra.mxu1 %v3577_v31  ;;  %1379 = vmatprep.mubr.f32.mxu1 %v3602_v43 }
 0x1c1   : > { %1535 = vmatmul.mubr.f32.gmra.mrb[74].mxu0 %v3540_v11  ;;  %2384 = vmatprep.subr.bf16.mxu1 %v3604_v44  ;;  %v4059_v11 = vpop.permute.xlu0 %884 }
 0x1c2   : > { %1540 = vmatprep.mubr.f32.mxu0 %v3602_v43 }
 0x1c3   : > { %1380 = vmatmul.mubr.f32.gmra.mrb[44].mxu1 %v3593_v36 }
 0x1c4   : > { %2400 = vmatpush1.bf16.msra.mxu1 %v3619_v52  ;;  %1385 = vmatprep.mubr.f32.mxu1 %v3631_v58 }
 0x1c5   : > { %1541 = vmatmul.mubr.f32.gmra.mrb[76].mxu0 %v3593_v36  ;;  %2385 = vmatprep.subr.bf16.mxu1 %v3643_v0 }
 0x1c6   : > { %1546 = vmatprep.mubr.f32.mxu0 %v3631_v58 }
 0x1c7   : > { %1386 = vmatmul.mubr.f32.gmra.mrb[46].mxu1 %v3616_v51 }
 0x1c8   : > { %2401 = vmatpush1.bf16.msra.mxu1 %v3653_v7  ;;  %1391 = vmatprep.mubr.f32.mxu1 %v3678_v25 }
 0x1c9   : > { %1547 = vmatmul.mubr.f32.gmra.mrb[78].mxu0 %v3616_v51  ;;  %2386 = vmatprep.subr.bf16.mxu1 %v3680_v27 }
 0x1cb   : > { %1392 = vmatmul.mubr.f32.gmra.mrb[48].mxu1 %v3669_v17 }
 0x1cc   : > { %2402 = vmatpush1.bf16.msra.mxu1 %v3695_v34  ;;  %1397 = vmatprep.mubr.f32.mxu1 %v3707_v42 }
 0x1cd   : > { %2387 = vmatprep.subr.bf16.mxu1 %v3719_v56 }
 0x1cf   : > { %1398 = vmatmul.mubr.f32.gmra.mrb[50].mxu1 %v3692_v33 }
 0x1d0   : > { %2403 = vmatpush1.bf16.msra.mxu1 %v3729_v62  ;;  %1403 = vmatprep.mubr.f32.mxu1 %v3754_v21 }
 0x1d1   : > { %2388 = vmatprep.subr.bf16.mxu1 %v3756_v22 }
 0x1d3   : > { %1404 = vmatmul.mubr.f32.gmra.mrb[52].mxu1 %v3745_v8 }
 0x1d4   : > { %2404 = vmatpush1.bf16.msra.mxu1 %v3771_v35  ;;  %1409 = vmatprep.mubr.f32.mxu1 %v4382_v53 }
 0x1d5   : > { %2389 = vmatprep.subr.bf16.mxu1 %v4383_v10 }
 0x1d7   : > { %1410 = vmatmul.mubr.f32.gmra.mrb[54].mxu1 %v4384_v13 }
 0x1d8   : > { %2405 = vmatpush1.bf16.msra.mxu1 %v4385_v14  ;;  %1415 = vmatprep.mubr.f32.mxu1 %v4386_v18 }
 0x1d9   : > { %2390 = vmatprep.subr.bf16.mxu1 %v3832_v49  ;;  %v4089_v49 = vpop.permute.xlu0 %899 }
 0x1db   : > { %1416 = vmatmul.mubr.f32.gmra.mrb[56].mxu1 %v3821_v29 }
 0x1dc   : > { %2406 = vmatpush1.bf16.msra.mxu1 %v3847_v63  ;;  %1421 = vmatprep.mubr.f32.mxu1 %v4387_v20 }
 0x1dd   : > { %2391 = vmatprep.subr.bf16.mxu1 %v4388_v24  ;;  %v4108_v47 = vpop.permute.xlu0 %909 }
 0x1df   : > { %1422 = vmatmul.mubr.f32.gmra.mrb[58].mxu1 %v4389_v28 }
 0x1e0   : > { %2407 = vmatpush1.bf16.msra.mxu1 %v4390_v37  ;;  %1427 = vmatprep.mubr.f32.mxu1 %v4391_v39 }
 0x1e1   : > { %2392 = vmatprep.subr.bf16.mxu1 %v3908_v4 }
 0x1e3   : > { %1428 = vmatmul.mubr.f32.gmra.mrb[60].mxu1 %v3897_v3 }
 0x1e4   : > { %2408 = vmatpush1.bf16.msra.mxu1 %v3920_v2  ;;  %1433 = vmatprep.mubr.f32.mxu1 %v3929_v57 }
 0x1e5   : > { %2393 = vmatprep.subr.bf16.mxu1 %v3941_v23 }
 0x1e7   : > { %1434 = vmatmul.mubr.f32.gmra.mrb[62].mxu1 %v3917_v40 }
 0x1e8   : > { %2409 = vmatpush1.bf16.msra.mxu1 %v3945_v15  ;;  %1552 = vmatprep.mubr.f32.mxu1 %v3678_v25 }
 0x1eb   : > { %1553 = vmatmul.mubr.f32.vlgmr.msra.gmra.mrb[64].mxu1 %v3669_v17 }
 0x1ec   : > { %1558 = vmatprep.mubr.f32.mxu1 %v3707_v42  ;;  %v4079_v42 = vpop.permute.xlu1 %894 }
 0x1ef   : > { %1559 = vmatmul.mubr.f32.gmra.mrb[66].mxu1 %v3692_v33 }
 0x1f0   : > { %1564 = vmatprep.mubr.f32.mxu1 %v3754_v21  ;;  %v4098_v38 = vpop.permute.xlu1 %904 }
 0x1f3   : > { %1565 = vmatmul.mubr.f32.gmra.mrb[68].mxu1 %v3745_v8 }
 0x1f4   : > { %1570 = vmatprep.mubr.f32.mxu1 %v4382_v53  ;;  %v4118_v37 = vpop.permute.xlu1 %914 }
 0x1f7   : > { %1571 = vmatmul.mubr.f32.gmra.mrb[70].mxu1 %v4384_v13 }
 0x1f8   : > { %1576 = vmatprep.mubr.f32.mxu1 %v4386_v18 }
 0x1fb   : > { %1577 = vmatmul.mubr.f32.gmra.mrb[72].mxu1 %v3821_v29 }
 0x1fc   : > { %1582 = vmatprep.mubr.f32.mxu1 %v4387_v20 }
 0x1ff   : > { %1583 = vmatmul.mubr.f32.gmra.mrb[74].mxu1 %v4389_v28 }
 0x200   : > { %1588 = vmatprep.mubr.f32.mxu1 %v4391_v39 }
 0x203   : > { %1589 = vmatmul.mubr.f32.gmra.mrb[76].mxu1 %v3897_v3 }
 0x204   : > { %1594 = vmatprep.mubr.f32.mxu1 %v3929_v57 }
 0x207   : > { %1595 = vmatmul.mubr.f32.gmra.mrb[78].mxu1 %v3917_v40 }
 0x23e   : > { %v1023_v45 = vpop.f32.mrb[0].mxu1  ;;  %v1184_v46 = vpop.f32.mrb[32].mxu0 }
 0x23f   : > { %v1024_v50 = vadd.f32 %v1023_v45, %v4053_v41  ;;  %v1185_v55 = vadd.f32 %v1184_v46, %v4053_v41  ;;  %v1025_v59 = vpop.f32.mrb[1].mxu1  ;;  %v1186_v1 = vpop.f32.mrb[33].mxu0 }
 0x240   : > { %v1026_v5 = vadd.f32 %v1025_v59, %v4053_v41  ;;  %v1187_v6 = vadd.f32 %v1186_v1, %v4053_v41 }
 0x241   : > { %1601 = vst [vmem:[%s2553_s10] sm:$0xff] %v1024_v50  ;;  %1603 = vst [vmem:[%s2553_s10 + $0x10] sm:$0xff] %v1185_v55 }
 0x242   : > { %1602 = vst [vmem:[%s2553_s10 + $0x8] sm:$0xff] %v1026_v5  ;;  %1604 = vst [vmem:[%s2553_s10 + $0x18] sm:$0xff] %v1187_v6  ;;  %v1029_v19 = vpop.f32.mrb[2].mxu1  ;;  %v1190_v26 = vpop.f32.mrb[34].mxu0 }
 0x243   : > { %v1030_v31 = vadd.f32 %v1029_v19, %v4059_v11  ;;  %v1191_v36 = vadd.f32 %v1190_v26, %v4059_v11  ;;  %v1031_v43 = vpop.f32.mrb[3].mxu1  ;;  %v1192_v44 = vpop.f32.mrb[35].mxu0 }
 0x244   : > { %v1032_v51 = vadd.f32 %v1031_v43, %v4059_v11  ;;  %v1193_v52 = vadd.f32 %v1192_v44, %v4059_v11  ;;  %v4128_v6 = vpop.permute.xlu0 %919 }
 0x245   : > { %1609 = vst [vmem:[%s2553_s10 + $0x40] sm:$0xff] %v1030_v31  ;;  %1611 = vst [vmem:[%s2553_s10 + $0x50] sm:$0xff] %v1191_v36 }
 0x246   : > { %1610 = vst [vmem:[%s2553_s10 + $0x48] sm:$0xff] %v1032_v51  ;;  %1612 = vst [vmem:[%s2553_s10 + $0x58] sm:$0xff] %v1193_v52  ;;  %v1035_v58 = vpop.f32.mrb[4].mxu1  ;;  %v1196_v0 = vpop.f32.mrb[36].mxu0 }
 0x247   : > { %v1036_v7 = vadd.f32 %v1035_v58, %v4063_v12  ;;  %v1197_v17 = vadd.f32 %v1196_v0, %v4063_v12  ;;  %v1037_v25 = vpop.f32.mrb[5].mxu1  ;;  %v1198_v27 = vpop.f32.mrb[37].mxu0 }
 0x248   : > { %v1038_v33 = vadd.f32 %v1037_v25, %v4063_v12  ;;  %v1199_v34 = vadd.f32 %v1198_v27, %v4063_v12  ;;  %v4138_v58 = vpop.permute.xlu1 %924 }
 0x249   : > { %1617 = vst [vmem:[%s2553_s10 + $0x80] sm:$0xff] %v1036_v7  ;;  %1619 = vst [vmem:[%s2553_s10 + $0x90] sm:$0xff] %v1197_v17 }
 0x24a   : > { %1618 = vst [vmem:[%s2553_s10 + $0x88] sm:$0xff] %v1038_v33  ;;  %1620 = vst [vmem:[%s2553_s10 + $0x98] sm:$0xff] %v1199_v34  ;;  %v1041_v56 = vpop.f32.mrb[6].mxu1  ;;  %v1202_v62 = vpop.f32.mrb[38].mxu0 }
 0x24b   : > { %v1042_v8 = vadd.f32 %v1041_v56, %v4079_v42  ;;  %v1203_v21 = vadd.f32 %v1202_v62, %v4079_v42  ;;  %v1043_v22 = vpop.f32.mrb[7].mxu1  ;;  %v1204_v35 = vpop.f32.mrb[39].mxu0 }
 0x24c   : > { %v1044_v4 = vadd.f32 %v1043_v22, %v4079_v42  ;;  %v1205_v29 = vadd.f32 %v1204_v35, %v4079_v42  ;;  %v4148_v62 = vpop.permute.xlu0 %929 }
 0x24d   : > { %1625 = vst [vmem:[%s2553_s10 + $0xc0] sm:$0xff] %v1042_v8  ;;  %1627 = vst [vmem:[%s2553_s10 + $0xd0] sm:$0xff] %v1203_v21 }
 0x24e   : > { %1626 = vst [vmem:[%s2553_s10 + $0xc8] sm:$0xff] %v1044_v4  ;;  %1628 = vst [vmem:[%s2553_s10 + $0xd8] sm:$0xff] %v1205_v29  ;;  %v1047_v2 = vpop.f32.mrb[8].mxu1 }
 0x24f   : > { %v1048_v63 = vadd.f32 %v1047_v2, %v4089_v49  ;;  %v1208_v3 = vpop.f32.mrb[40].mxu0  ;;  %v1049_v9 = vpop.f32.mrb[9].mxu1 }
 0x250   : > { %v1209_v16 = vadd.f32 %v1208_v3, %v4089_v49  ;;  %v1050_v23 = vadd.f32 %v1049_v9, %v4089_v49  ;;  %v1210_v61 = vpop.f32.mrb[41].mxu0  ;;  %v4158_v3 = vpop.permute.xlu1 %934 }
 0x251   : > { %1633 = vst [vmem:[%s2553_s10 + $0x100] sm:$0xff] %v1048_v63  ;;  %v1211_v40 = vadd.f32 %v1210_v61, %v4089_v49 }
 0x252   : > { %1635 = vst [vmem:[%s2553_s10 + $0x110] sm:$0xff] %v1209_v16  ;;  %1634 = vst [vmem:[%s2553_s10 + $0x108] sm:$0xff] %v1050_v23  ;;  %v1053_v48 = vpop.f32.mrb[10].mxu1 }
 0x253   : > { %1636 = vst [vmem:[%s2553_s10 + $0x118] sm:$0xff] %v1211_v40  ;;  %v1054_v54 = vadd.f32 %v1053_v48, %v4098_v38  ;;  %v1214_v57 = vpop.f32.mrb[42].mxu0  ;;  %v1055_v60 = vpop.f32.mrb[11].mxu1 }
 0x254   : > { %v1215_v32 = vadd.f32 %v1214_v57, %v4098_v38  ;;  %v1056_v15 = vadd.f32 %v1055_v60, %v4098_v38  ;;  %v1216_v30 = vpop.f32.mrb[43].mxu0  ;;  %v4168_v60 = vpop.permute.xlu0 %939 }
 0x255   : > { %1641 = vst [vmem:[%s2553_s10 + $0x140] sm:$0xff] %v1054_v54  ;;  %v1217_v53 = vadd.f32 %v1216_v30, %v4098_v38 }
 0x256   : > { %1643 = vst [vmem:[%s2553_s10 + $0x150] sm:$0xff] %v1215_v32  ;;  %1642 = vst [vmem:[%s2553_s10 + $0x148] sm:$0xff] %v1056_v15  ;;  %v1059_v10 = vpop.f32.mrb[12].mxu1 }
 0x257   : > { %1644 = vst [vmem:[%s2553_s10 + $0x158] sm:$0xff] %v1217_v53  ;;  %v1060_v13 = vadd.f32 %v1059_v10, %v4108_v47  ;;  %v1220_v14 = vpop.f32.mrb[44].mxu0  ;;  %v1061_v18 = vpop.f32.mrb[13].mxu1 }
 0x258   : > { %v1221_v20 = vadd.f32 %v1220_v14, %v4108_v47  ;;  %v1062_v24 = vadd.f32 %v1061_v18, %v4108_v47  ;;  %v1222_v28 = vpop.f32.mrb[45].mxu0 }
 0x259   : > { %1649 = vst [vmem:[%s2553_s10 + $0x180] sm:$0xff] %v1060_v13  ;;  %v1223_v39 = vadd.f32 %v1222_v28, %v4108_v47 }
 0x25a   : > { %1651 = vst [vmem:[%s2553_s10 + $0x190] sm:$0xff] %v1221_v20  ;;  %1650 = vst [vmem:[%s2553_s10 + $0x188] sm:$0xff] %v1062_v24  ;;  %v1065_v45 = vpop.f32.mrb[14].mxu1  ;;  %v4178_v20 = vpop.permute.xlu1 %944 }
 0x25b   : > { %1652 = vst [vmem:[%s2553_s10 + $0x198] sm:$0xff] %v1223_v39  ;;  %v1066_v46 = vadd.f32 %v1065_v45, %v4118_v37  ;;  %v1226_v50 = vpop.f32.mrb[46].mxu0  ;;  %v1067_v55 = vpop.f32.mrb[15].mxu1 }
 0x25c   : > { %v1227_v59 = vadd.f32 %v1226_v50, %v4118_v37  ;;  %v1068_v1 = vadd.f32 %v1067_v55, %v4118_v37  ;;  %v1228_v5 = vpop.f32.mrb[47].mxu0 }
 0x25d   : > { %1657 = vst [vmem:[%s2553_s10 + $0x1c0] sm:$0xff] %v1066_v46  ;;  %v1229_v19 = vadd.f32 %v1228_v5, %v4118_v37 }
 0x25e   : > { %1659 = vst [vmem:[%s2553_s10 + $0x1d0] sm:$0xff] %v1227_v59  ;;  %1658 = vst [vmem:[%s2553_s10 + $0x1c8] sm:$0xff] %v1068_v1  ;;  %v1071_v26 = vpop.f32.mrb[16].mxu1  ;;  %v4188_v1 = vpop.permute.xlu0 %949 }
 0x25f   : > { %1660 = vst [vmem:[%s2553_s10 + $0x1d8] sm:$0xff] %v1229_v19  ;;  %v1072_v31 = vadd.f32 %v1071_v26, %v4128_v6  ;;  %v1232_v36 = vpop.f32.mrb[48].mxu0  ;;  %v1073_v43 = vpop.f32.mrb[17].mxu1 }
 0x260   : > { %v1233_v44 = vadd.f32 %v1232_v36, %v4128_v6  ;;  %v1074_v51 = vadd.f32 %v1073_v43, %v4128_v6  ;;  %v1234_v52 = vpop.f32.mrb[49].mxu0 }
 0x261   : > { %1665 = vst [vmem:[%s2553_s10 + $0x200] sm:$0xff] %v1072_v31  ;;  %v1235_v0 = vadd.f32 %v1234_v52, %v4128_v6  ;;  %v4198_v52 = vpop.permute.xlu1 %954 }
 0x262   : > { %1667 = vst [vmem:[%s2553_s10 + $0x210] sm:$0xff] %v1233_v44  ;;  %1666 = vst [vmem:[%s2553_s10 + $0x208] sm:$0xff] %v1074_v51  ;;  %v1077_v7 = vpop.f32.mrb[18].mxu1 }
 0x263   : > { %1668 = vst [vmem:[%s2553_s10 + $0x218] sm:$0xff] %v1235_v0  ;;  %v1078_v17 = vadd.f32 %v1077_v7, %v4138_v58  ;;  %v1238_v25 = vpop.f32.mrb[50].mxu0  ;;  %v1079_v27 = vpop.f32.mrb[19].mxu1 }
 0x264   : > { %v1239_v33 = vadd.f32 %v1238_v25, %v4138_v58  ;;  %v1080_v34 = vadd.f32 %v1079_v27, %v4138_v58  ;;  %v1240_v56 = vpop.f32.mrb[51].mxu0 }
 0x265   : > { %1673 = vst [vmem:[%s2553_s10 + $0x240] sm:$0xff] %v1078_v17  ;;  %v1241_v8 = vadd.f32 %v1240_v56, %v4138_v58 }
 0x266   : > { %1675 = vst [vmem:[%s2553_s10 + $0x250] sm:$0xff] %v1239_v33  ;;  %1674 = vst [vmem:[%s2553_s10 + $0x248] sm:$0xff] %v1080_v34  ;;  %v1083_v21 = vpop.f32.mrb[20].mxu1 }
 0x267   : > { %1676 = vst [vmem:[%s2553_s10 + $0x258] sm:$0xff] %v1241_v8  ;;  %v1084_v22 = vadd.f32 %v1083_v21, %v4148_v62  ;;  %v1244_v35 = vpop.f32.mrb[52].mxu0  ;;  %v1085_v4 = vpop.f32.mrb[21].mxu1 }
 0x268   : > { %v1245_v29 = vadd.f32 %v1244_v35, %v4148_v62  ;;  %v1086_v2 = vadd.f32 %v1085_v4, %v4148_v62  ;;  %v1246_v63 = vpop.f32.mrb[53].mxu0 }
 0x269   : > { %1681 = vst [vmem:[%s2553_s10 + $0x280] sm:$0xff] %v1084_v22  ;;  %v1247_v9 = vadd.f32 %v1246_v63, %v4148_v62 }
 0x26a   : > { %1683 = vst [vmem:[%s2553_s10 + $0x290] sm:$0xff] %v1245_v29  ;;  %1682 = vst [vmem:[%s2553_s10 + $0x288] sm:$0xff] %v1086_v2  ;;  %v1089_v16 = vpop.f32.mrb[22].mxu1 }
 0x26b   : > { %1684 = vst [vmem:[%s2553_s10 + $0x298] sm:$0xff] %v1247_v9  ;;  %v1090_v23 = vadd.f32 %v1089_v16, %v4158_v3  ;;  %v1250_v61 = vpop.f32.mrb[54].mxu0  ;;  %v1091_v40 = vpop.f32.mrb[23].mxu1 }
 0x26c   : > { %v1251_v48 = vadd.f32 %v1250_v61, %v4158_v3  ;;  %v1092_v54 = vadd.f32 %v1091_v40, %v4158_v3  ;;  %v1252_v57 = vpop.f32.mrb[55].mxu0 }
 0x26d   : > { %1689 = vst [vmem:[%s2553_s10 + $0x2c0] sm:$0xff] %v1090_v23  ;;  %v1253_v32 = vadd.f32 %v1252_v57, %v4158_v3 }
 0x26e   : > { %1691 = vst [vmem:[%s2553_s10 + $0x2d0] sm:$0xff] %v1251_v48  ;;  %1690 = vst [vmem:[%s2553_s10 + $0x2c8] sm:$0xff] %v1092_v54  ;;  %v1095_v15 = vpop.f32.mrb[24].mxu1 }
 0x26f   : > { %1692 = vst [vmem:[%s2553_s10 + $0x2d8] sm:$0xff] %v1253_v32  ;;  %v1096_v30 = vadd.f32 %v1095_v15, %v4168_v60  ;;  %v1256_v53 = vpop.f32.mrb[56].mxu0  ;;  %v1097_v10 = vpop.f32.mrb[25].mxu1 }
 0x270   : > { %v1257_v13 = vadd.f32 %v1256_v53, %v4168_v60  ;;  %v1098_v14 = vadd.f32 %v1097_v10, %v4168_v60  ;;  %v1258_v18 = vpop.f32.mrb[57].mxu0 }
 0x271   : > { %1697 = vst [vmem:[%s2553_s10 + $0x300] sm:$0xff] %v1096_v30  ;;  %v1259_v24 = vadd.f32 %v1258_v18, %v4168_v60 }
 0x272   : > { %1699 = vst [vmem:[%s2553_s10 + $0x310] sm:$0xff] %v1257_v13  ;;  %1698 = vst [vmem:[%s2553_s10 + $0x308] sm:$0xff] %v1098_v14  ;;  %v1101_v28 = vpop.f32.mrb[26].mxu1 }
 0x273   : > { %1700 = vst [vmem:[%s2553_s10 + $0x318] sm:$0xff] %v1259_v24  ;;  %v1102_v39 = vadd.f32 %v1101_v28, %v4178_v20  ;;  %v1262_v45 = vpop.f32.mrb[58].mxu0  ;;  %v1103_v46 = vpop.f32.mrb[27].mxu1 }
 0x274   : > { %v1263_v50 = vadd.f32 %v1262_v45, %v4178_v20  ;;  %v1104_v55 = vadd.f32 %v1103_v46, %v4178_v20  ;;  %v1264_v59 = vpop.f32.mrb[59].mxu0 }
 0x275   : > { %1705 = vst [vmem:[%s2553_s10 + $0x340] sm:$0xff] %v1102_v39  ;;  %v1265_v5 = vadd.f32 %v1264_v59, %v4178_v20 }
 0x276   : > { %1707 = vst [vmem:[%s2553_s10 + $0x350] sm:$0xff] %v1263_v50  ;;  %1706 = vst [vmem:[%s2553_s10 + $0x348] sm:$0xff] %v1104_v55  ;;  %v1107_v19 = vpop.f32.mrb[28].mxu1 }
 0x277   : > { %1708 = vst [vmem:[%s2553_s10 + $0x358] sm:$0xff] %v1265_v5  ;;  %v1108_v26 = vadd.f32 %v1107_v19, %v4188_v1  ;;  %v1268_v31 = vpop.f32.mrb[60].mxu0  ;;  %v1109_v36 = vpop.f32.mrb[29].mxu1 }
 0x278   : > { %v1269_v43 = vadd.f32 %v1268_v31, %v4188_v1  ;;  %v1110_v44 = vadd.f32 %v1109_v36, %v4188_v1  ;;  %v1270_v51 = vpop.f32.mrb[61].mxu0 }
 0x279   : > { %1713 = vst [vmem:[%s2553_s10 + $0x380] sm:$0xff] %v1108_v26  ;;  %v1271_v0 = vadd.f32 %v1270_v51, %v4188_v1 }
 0x27a   : > { %1715 = vst [vmem:[%s2553_s10 + $0x390] sm:$0xff] %v1269_v43  ;;  %1714 = vst [vmem:[%s2553_s10 + $0x388] sm:$0xff] %v1110_v44  ;;  %v1113_v7 = vpop.f32.mrb[30].mxu1 }
 0x27b   : > { %1716 = vst [vmem:[%s2553_s10 + $0x398] sm:$0xff] %v1271_v0  ;;  %v1114_v17 = vadd.f32 %v1113_v7, %v4198_v52  ;;  %v1274_v25 = vpop.f32.mrb[62].mxu0  ;;  %v1115_v27 = vpop.f32.mrb[31].mxu1 }
 0x27c   : > { %v1275_v33 = vadd.f32 %v1274_v25, %v4198_v52  ;;  %v1116_v34 = vadd.f32 %v1115_v27, %v4198_v52  ;;  %v1276_v56 = vpop.f32.mrb[63].mxu0 }
 0x27d   : > { %1721 = vst [vmem:[%s2553_s10 + $0x3c0] sm:$0xff] %v1114_v17  ;;  %v1277_v8 = vadd.f32 %v1276_v56, %v4198_v52 }
 0x27e   : > { %1723 = vst [vmem:[%s2553_s10 + $0x3d0] sm:$0xff] %v1275_v33  ;;  %1722 = vst [vmem:[%s2553_s10 + $0x3c8] sm:$0xff] %v1116_v34  ;;  %v1345_v21 = vpop.f32.mrb[32].mxu1 }
 0x27f   : > { %1724 = vst [vmem:[%s2553_s10 + $0x3d8] sm:$0xff] %v1277_v8  ;;  %v1346_v22 = vadd.f32 %v1345_v21, %v4053_v41  ;;  %v1347_v35 = vpop.f32.mrb[33].mxu1 }
 0x280   : > { %v1506_v4 = vpop.f32.mrb[64].mxu0  ;;  %v1348_v29 = vadd.f32 %v1347_v35, %v4053_v41 }
 0x281   : > { %1605 = vst [vmem:[%s2553_s10 + $0x20] sm:$0xff] %v1346_v22  ;;  %v1507_v2 = vadd.f32 %v1506_v4, %v4053_v41  ;;  %v1508_v63 = vpop.f32.mrb[65].mxu0 }
 0x282   : > { %1606 = vst [vmem:[%s2553_s10 + $0x28] sm:$0xff] %v1348_v29  ;;  %v1509_v9 = vadd.f32 %v1508_v63, %v4053_v41  ;;  %v1351_v16 = vpop.f32.mrb[34].mxu1 }
 0x283   : > { %1607 = vst [vmem:[%s2553_s10 + $0x30] sm:$0xff] %v1507_v2  ;;  %v1352_v23 = vadd.f32 %v1351_v16, %v4059_v11  ;;  %v1353_v61 = vpop.f32.mrb[35].mxu1 }
 0x284   : > { %1608 = vst [vmem:[%s2553_s10 + $0x38] sm:$0xff] %v1509_v9  ;;  %v1512_v40 = vpop.f32.mrb[66].mxu0  ;;  %v1354_v48 = vadd.f32 %v1353_v61, %v4059_v11 }
 0x285   : > { %1613 = vst [vmem:[%s2553_s10 + $0x60] sm:$0xff] %v1352_v23  ;;  %v1513_v54 = vadd.f32 %v1512_v40, %v4059_v11  ;;  %v1514_v57 = vpop.f32.mrb[67].mxu0 }
 0x286   : > { %1614 = vst [vmem:[%s2553_s10 + $0x68] sm:$0xff] %v1354_v48  ;;  %v1515_v41 = vadd.f32 %v1514_v57, %v4059_v11  ;;  %v1357_v32 = vpop.f32.mrb[36].mxu1 }
 0x287   : > { %1615 = vst [vmem:[%s2553_s10 + $0x70] sm:$0xff] %v1513_v54  ;;  %v1358_v15 = vadd.f32 %v1357_v32, %v4063_v12  ;;  %v1359_v30 = vpop.f32.mrb[37].mxu1 }
 0x288   : > { %1616 = vst [vmem:[%s2553_s10 + $0x78] sm:$0xff] %v1515_v41  ;;  %v1518_v53 = vpop.f32.mrb[68].mxu0  ;;  %v1360_v10 = vadd.f32 %v1359_v30, %v4063_v12 }
 0x289   : > { %1621 = vst [vmem:[%s2553_s10 + $0xa0] sm:$0xff] %v1358_v15  ;;  %v1519_v13 = vadd.f32 %v1518_v53, %v4063_v12  ;;  %v1520_v14 = vpop.f32.mrb[69].mxu0 }
 0x28a   : > { %1622 = vst [vmem:[%s2553_s10 + $0xa8] sm:$0xff] %v1360_v10  ;;  %v1521_v11 = vadd.f32 %v1520_v14, %v4063_v12  ;;  %v1363_v18 = vpop.f32.mrb[38].mxu1 }
 0x28b   : > { %1623 = vst [vmem:[%s2553_s10 + $0xb0] sm:$0xff] %v1519_v13  ;;  %v1364_v24 = vadd.f32 %v1363_v18, %v4079_v42  ;;  %v1365_v28 = vpop.f32.mrb[39].mxu1 }
 0x28c   : > { %1624 = vst [vmem:[%s2553_s10 + $0xb8] sm:$0xff] %v1521_v11  ;;  %v1524_v39 = vpop.f32.mrb[70].mxu0  ;;  %v1366_v45 = vadd.f32 %v1365_v28, %v4079_v42 }
 0x28d   : > { %1629 = vst [vmem:[%s2553_s10 + $0xe0] sm:$0xff] %v1364_v24  ;;  %v1525_v46 = vadd.f32 %v1524_v39, %v4079_v42  ;;  %v1526_v50 = vpop.f32.mrb[71].mxu0 }
 0x28e   : > { %1630 = vst [vmem:[%s2553_s10 + $0xe8] sm:$0xff] %v1366_v45  ;;  %v1527_v12 = vadd.f32 %v1526_v50, %v4079_v42  ;;  %v1369_v55 = vpop.f32.mrb[40].mxu1 }
 0x28f   : > { %1631 = vst [vmem:[%s2553_s10 + $0xf0] sm:$0xff] %v1525_v46  ;;  %v1370_v59 = vadd.f32 %v1369_v55, %v4089_v49  ;;  %v1371_v5 = vpop.f32.mrb[41].mxu1 }
 0x290   : > { %1632 = vst [vmem:[%s2553_s10 + $0xf8] sm:$0xff] %v1527_v12  ;;  %v1530_v19 = vpop.f32.mrb[72].mxu0  ;;  %v1372_v26 = vadd.f32 %v1371_v5, %v4089_v49 }
 0x291   : > { %1637 = vst [vmem:[%s2553_s10 + $0x120] sm:$0xff] %v1370_v59  ;;  %v1531_v31 = vadd.f32 %v1530_v19, %v4089_v49  ;;  %v1532_v36 = vpop.f32.mrb[73].mxu0 }
 0x292   : > { %1638 = vst [vmem:[%s2553_s10 + $0x128] sm:$0xff] %v1372_v26  ;;  %v1533_v42 = vadd.f32 %v1532_v36, %v4089_v49  ;;  %v1375_v43 = vpop.f32.mrb[42].mxu1 }
 0x293   : > { %1639 = vst [vmem:[%s2553_s10 + $0x130] sm:$0xff] %v1531_v31  ;;  %v1376_v44 = vadd.f32 %v1375_v43, %v4098_v38  ;;  %v1377_v51 = vpop.f32.mrb[43].mxu1 }
 0x294   : > { %1640 = vst [vmem:[%s2553_s10 + $0x138] sm:$0xff] %v1533_v42  ;;  %v1536_v0 = vpop.f32.mrb[74].mxu0  ;;  %v1378_v7 = vadd.f32 %v1377_v51, %v4098_v38 }
 0x295   : > { %1645 = vst [vmem:[%s2553_s10 + $0x160] sm:$0xff] %v1376_v44  ;;  %v1537_v17 = vadd.f32 %v1536_v0, %v4098_v38  ;;  %v1538_v25 = vpop.f32.mrb[75].mxu0 }
 0x296   : > { %1646 = vst [vmem:[%s2553_s10 + $0x168] sm:$0xff] %v1378_v7  ;;  %v1539_v49 = vadd.f32 %v1538_v25, %v4098_v38  ;;  %v1381_v27 = vpop.f32.mrb[44].mxu1 }
 0x297   : > { %1647 = vst [vmem:[%s2553_s10 + $0x170] sm:$0xff] %v1537_v17  ;;  %v1382_v33 = vadd.f32 %v1381_v27, %v4108_v47  ;;  %v1383_v34 = vpop.f32.mrb[45].mxu1 }
 0x298   : > { %1648 = vst [vmem:[%s2553_s10 + $0x178] sm:$0xff] %v1539_v49  ;;  %v1542_v56 = vpop.f32.mrb[76].mxu0  ;;  %v1384_v8 = vadd.f32 %v1383_v34, %v4108_v47 }
 0x299   : > { %1653 = vst [vmem:[%s2553_s10 + $0x1a0] sm:$0xff] %v1382_v33  ;;  %v1543_v21 = vadd.f32 %v1542_v56, %v4108_v47  ;;  %v1544_v22 = vpop.f32.mrb[77].mxu0 }
 0x29a   : > { %1654 = vst [vmem:[%s2553_s10 + $0x1a8] sm:$0xff] %v1384_v8  ;;  %v1545_v38 = vadd.f32 %v1544_v22, %v4108_v47  ;;  %v1387_v35 = vpop.f32.mrb[46].mxu1 }
 0x29b   : > { %1655 = vst [vmem:[%s2553_s10 + $0x1b0] sm:$0xff] %v1543_v21  ;;  %v1388_v4 = vadd.f32 %v1387_v35, %v4118_v37  ;;  %v1389_v29 = vpop.f32.mrb[47].mxu1 }
 0x29c   : > { %1656 = vst [vmem:[%s2553_s10 + $0x1b8] sm:$0xff] %v1545_v38  ;;  %v1548_v2 = vpop.f32.mrb[78].mxu0  ;;  %v1390_v63 = vadd.f32 %v1389_v29, %v4118_v37 }
 0x29d   : > { %1661 = vst [vmem:[%s2553_s10 + $0x1e0] sm:$0xff] %v1388_v4  ;;  %v1549_v9 = vadd.f32 %v1548_v2, %v4118_v37  ;;  %v1550_v16 = vpop.f32.mrb[79].mxu0 }
 0x29e   : > { %1662 = vst [vmem:[%s2553_s10 + $0x1e8] sm:$0xff] %v1390_v63  ;;  %v1551_v47 = vadd.f32 %v1550_v16, %v4118_v37  ;;  %v1393_v23 = vpop.f32.mrb[48].mxu1 }
 0x29f   : > { %1663 = vst [vmem:[%s2553_s10 + $0x1f0] sm:$0xff] %v1549_v9  ;;  %v1394_v61 = vadd.f32 %v1393_v23, %v4128_v6  ;;  %v1395_v40 = vpop.f32.mrb[49].mxu1 }
 0x2a0   : > { %1664 = vst [vmem:[%s2553_s10 + $0x1f8] sm:$0xff] %v1551_v47  ;;  %v1396_v48 = vadd.f32 %v1395_v40, %v4128_v6 }
 0x2a1   : > { %1669 = vst [vmem:[%s2553_s10 + $0x220] sm:$0xff] %v1394_v61 }
 0x2a2   : > { %1670 = vst [vmem:[%s2553_s10 + $0x228] sm:$0xff] %v1396_v48  ;;  %v1399_v54 = vpop.f32.mrb[50].mxu1 }
 0x2a3   : > { %v1400_v57 = vadd.f32 %v1399_v54, %v4138_v58  ;;  %v1401_v41 = vpop.f32.mrb[51].mxu1 }
 0x2a4   : > { %v1402_v37 = vadd.f32 %v1401_v41, %v4138_v58 }
 0x2a5   : > { %1677 = vst [vmem:[%s2553_s10 + $0x260] sm:$0xff] %v1400_v57 }
 0x2a6   : > { %1678 = vst [vmem:[%s2553_s10 + $0x268] sm:$0xff] %v1402_v37  ;;  %v1405_v32 = vpop.f32.mrb[52].mxu1 }
 0x2a7   : > { %v1406_v15 = vadd.f32 %v1405_v32, %v4148_v62  ;;  %v1407_v30 = vpop.f32.mrb[53].mxu1 }
 0x2a8   : > { %v1408_v53 = vadd.f32 %v1407_v30, %v4148_v62 }
 0x2a9   : > { %1685 = vst [vmem:[%s2553_s10 + $0x2a0] sm:$0xff] %v1406_v15 }
 0x2aa   : > { %1686 = vst [vmem:[%s2553_s10 + $0x2a8] sm:$0xff] %v1408_v53  ;;  %v1411_v10 = vpop.f32.mrb[54].mxu1 }
 0x2ab   : > { %v1412_v13 = vadd.f32 %v1411_v10, %v4158_v3  ;;  %v1413_v14 = vpop.f32.mrb[55].mxu1 }
 0x2ac   : > { %v1414_v11 = vadd.f32 %v1413_v14, %v4158_v3 }
 0x2ad   : > { %1693 = vst [vmem:[%s2553_s10 + $0x2e0] sm:$0xff] %v1412_v13 }
 0x2ae   : > { %1694 = vst [vmem:[%s2553_s10 + $0x2e8] sm:$0xff] %v1414_v11  ;;  %v1417_v18 = vpop.f32.mrb[56].mxu1 }
 0x2af   : > { %v1418_v24 = vadd.f32 %v1417_v18, %v4168_v60  ;;  %v1419_v28 = vpop.f32.mrb[57].mxu1 }
 0x2b0   : > { %v1420_v39 = vadd.f32 %v1419_v28, %v4168_v60 }
 0x2b1   : > { %1701 = vst [vmem:[%s2553_s10 + $0x320] sm:$0xff] %v1418_v24 }
 0x2b2   : > { %1702 = vst [vmem:[%s2553_s10 + $0x328] sm:$0xff] %v1420_v39  ;;  %v1423_v45 = vpop.f32.mrb[58].mxu1 }
 0x2b3   : > { %v1424_v46 = vadd.f32 %v1423_v45, %v4178_v20  ;;  %v1425_v50 = vpop.f32.mrb[59].mxu1 }
 0x2b4   : > { %v1426_v12 = vadd.f32 %v1425_v50, %v4178_v20 }
 0x2b5   : > { %1709 = vst [vmem:[%s2553_s10 + $0x360] sm:$0xff] %v1424_v46 }
 0x2b6   : > { %1710 = vst [vmem:[%s2553_s10 + $0x368] sm:$0xff] %v1426_v12  ;;  %v1429_v55 = vpop.f32.mrb[60].mxu1 }
 0x2b7   : > { %v1430_v59 = vadd.f32 %v1429_v55, %v4188_v1  ;;  %v1431_v5 = vpop.f32.mrb[61].mxu1 }
 0x2b8   : > { %v1432_v19 = vadd.f32 %v1431_v5, %v4188_v1 }
 0x2b9   : > { %1717 = vst [vmem:[%s2553_s10 + $0x3a0] sm:$0xff] %v1430_v59 }
 0x2ba   : > { %1718 = vst [vmem:[%s2553_s10 + $0x3a8] sm:$0xff] %v1432_v19  ;;  %v1435_v26 = vpop.f32.mrb[62].mxu1 }
 0x2bb   : > { %v1436_v31 = vadd.f32 %v1435_v26, %v4198_v52  ;;  %v1437_v36 = vpop.f32.mrb[63].mxu1 }
 0x2bc   : > { %v1438_v42 = vadd.f32 %v1437_v36, %v4198_v52 }
 0x2bd   : > { %1725 = vst [vmem:[%s2553_s10 + $0x3e0] sm:$0xff] %v1436_v31 }
 0x2be   : > { %1726 = vst [vmem:[%s2553_s10 + $0x3e8] sm:$0xff] %v1438_v42  ;;  %v1554_v43 = vpop.f32.mrb[64].mxu1 }
 0x2bf   : > { %v1555_v44 = vadd.f32 %v1554_v43, %v4128_v6  ;;  %v1556_v51 = vpop.f32.mrb[65].mxu1 }
 0x2c0   : > { %v1557_v0 = vadd.f32 %v1556_v51, %v4128_v6 }
 0x2c1   : > { %1671 = vst [vmem:[%s2553_s10 + $0x230] sm:$0xff] %v1555_v44 }
 0x2c2   : > { %1672 = vst [vmem:[%s2553_s10 + $0x238] sm:$0xff] %v1557_v0  ;;  %v1560_v7 = vpop.f32.mrb[66].mxu1 }
 0x2c3   : > { %v1561_v17 = vadd.f32 %v1560_v7, %v4138_v58  ;;  %v1562_v25 = vpop.f32.mrb[67].mxu1 }
 0x2c4   : > { %v1563_v49 = vadd.f32 %v1562_v25, %v4138_v58 }
 0x2c5   : > { %1679 = vst [vmem:[%s2553_s10 + $0x270] sm:$0xff] %v1561_v17 }
 0x2c6   : > { %1680 = vst [vmem:[%s2553_s10 + $0x278] sm:$0xff] %v1563_v49  ;;  %v1566_v27 = vpop.f32.mrb[68].mxu1 }
 0x2c7   : > { %v1567_v33 = vadd.f32 %v1566_v27, %v4148_v62  ;;  %v1568_v34 = vpop.f32.mrb[69].mxu1 }
 0x2c8   : > { %v1569_v6 = vadd.f32 %v1568_v34, %v4148_v62 }
 0x2c9   : > { %1687 = vst [vmem:[%s2553_s10 + $0x2b0] sm:$0xff] %v1567_v33 }
 0x2ca   : > { %1688 = vst [vmem:[%s2553_s10 + $0x2b8] sm:$0xff] %v1569_v6  ;;  %v1572_v56 = vpop.f32.mrb[70].mxu1 }
 0x2cb   : > { %v1573_v8 = vadd.f32 %v1572_v56, %v4158_v3  ;;  %v1574_v21 = vpop.f32.mrb[71].mxu1 }
 0x2cc   : > { %v1575_v58 = vadd.f32 %v1574_v21, %v4158_v3 }
 0x2cd   : > { %1695 = vst [vmem:[%s2553_s10 + $0x2f0] sm:$0xff] %v1573_v8 }
 0x2ce   : > { %1696 = vst [vmem:[%s2553_s10 + $0x2f8] sm:$0xff] %v1575_v58  ;;  %v1578_v22 = vpop.f32.mrb[72].mxu1 }
 0x2cf   : > { %v1579_v38 = vadd.f32 %v1578_v22, %v4168_v60  ;;  %v1580_v35 = vpop.f32.mrb[73].mxu1 }
 0x2d0   : > { %v1581_v62 = vadd.f32 %v1580_v35, %v4168_v60 }
 0x2d1   : > { %1703 = vst [vmem:[%s2553_s10 + $0x330] sm:$0xff] %v1579_v38 }
 0x2d2   : > { %1704 = vst [vmem:[%s2553_s10 + $0x338] sm:$0xff] %v1581_v62  ;;  %v1584_v4 = vpop.f32.mrb[74].mxu1 }
 0x2d3   : > { %v1585_v29 = vadd.f32 %v1584_v4, %v4178_v20  ;;  %v1586_v2 = vpop.f32.mrb[75].mxu1 }
 0x2d4   : > { %v1587_v3 = vadd.f32 %v1586_v2, %v4178_v20 }
 0x2d5   : > { %1711 = vst [vmem:[%s2553_s10 + $0x370] sm:$0xff] %v1585_v29 }
 0x2d6   : > { %1712 = vst [vmem:[%s2553_s10 + $0x378] sm:$0xff] %v1587_v3  ;;  %v1590_v63 = vpop.f32.mrb[76].mxu1 }
 0x2d7   : > { %v1591_v9 = vadd.f32 %v1590_v63, %v4188_v1  ;;  %v1592_v16 = vpop.f32.mrb[77].mxu1 }
 0x2d8   : > { %v1593_v47 = vadd.f32 %v1592_v16, %v4188_v1 }
 0x2d9   : > { %1719 = vst [vmem:[%s2553_s10 + $0x3b0] sm:$0xff] %v1591_v9 }
 0x2da   : > { %1720 = vst [vmem:[%s2553_s10 + $0x3b8] sm:$0xff] %v1593_v47  ;;  %v1596_v60 = vpop.f32.mrb[78].mxu1 }
 0x2db   : > { %v1597_v23 = vadd.f32 %v1596_v60, %v4198_v52  ;;  %v1598_v61 = vpop.f32.mrb[79].mxu1 }
 0x2dc   : > { %v1599_v40 = vadd.f32 %v1598_v61, %v4198_v52 }
 0x2dd   : > { %1727 = vst [vmem:[%s2553_s10 + $0x3f0] sm:$0xff] %v1597_v23 }
 0x2de   : > { %1728 = vst [vmem:[%s2553_s10 + $0x3f8] sm:$0xff] %v1599_v40 }
 0x2df PF: > { %s15_s20 = sadd.s32 1, %s2483_s20   ;;  %s4392_s18 = smov %s2479_s19 }
 0x2e0   : > { %p12_p5 = scmp.ge.s32.totalorder %s15_s20, 4   ;;  %s4393_s19 = smov %s4395_s21 }
 0x2e2   :  { %14 = sbr.rel (!%p12_p5) target bundleno = 2 (0x2), region = 73 }

</bundles_post_ra>
